<compile_context>
chip_gen: v7x
topology: tpu7x:2x2x1
jax: 0.10.0
libtpu: 0.0.40
codegen_flags: <defaults>
</compile_context>

<pallas_src>
import functools

import jax
import jax.numpy as jnp
from jax.experimental import pallas as pl
from jax.experimental.pallas import tpu as pltpu

BN_EPS = 1e-5
_LANE = 128


# ---------------------------------------------------------------------------
# Hardware-aware sizing helpers
# ---------------------------------------------------------------------------
def _round_up(x, m):
    return ((x + m - 1) // m) * m


@functools.lru_cache(maxsize=None)
def _vmem_budget():
    """(vmem_limit_bytes, row_cap) keyed off the TPU generation."""
    try:
        phys = int(getattr(pltpu.get_tpu_info(), "vmem_capacity_bytes", 0) or 0)
    except Exception:
        phys = 0
    if phys > 64 * 1024 * 1024:          # v5e / v6e: 128 MiB physical VMEM
        return 64 * 1024 * 1024, 1536
    return 32 * 1024 * 1024, 512         # v7x (64 MiB) or unknown: conservative


def _cparams(n_axes, vmem_limit):
    return pltpu.CompilerParams(
        dimension_semantics=("parallel",) * n_axes,
        vmem_limit_bytes=vmem_limit)


def _pick_m_tile(m, cap):
    """Rows per tile: multiple of 16 (bf16 sublane packing), >= 2 tiles when
    possible (dual-TC on v7x), never a single huge block.  Callers zero-pad
    rows up to nt*tm; zero rows are exactly neutral for the statistics."""
    cap = max(16, (cap // 16) * 16)
    tm = min(cap, max(16, _round_up(-(-m // 2), 16)))
    nt = -(-m // tm)                      # ceil-div grid
    return tm, nt


# ---------------------------------------------------------------------------
# Pallas kernels
# ---------------------------------------------------------------------------
def _conv_stats_kernel(p_ref, w_ref, y_ref, sum_ref, sq_ref):
    # p_ref: (tm, K) bf16 im2col patches; w_ref: (K, Cout) bf16 (grid-resident)
    # y_ref: (tm, Cout) bf16 pre-BN conv output (half the HBM bytes of f32)
    # sum_ref / sq_ref: (1, 1, Cout) per-tile channel statistics, taken from
    # the f32 MXU accumulator (not degraded by the bf16 y store).
    acc = jnp.dot(p_ref[...], w_ref[...], preferred_element_type=jnp.float32)
    y_ref[...] = acc.astype(y_ref.dtype)
    sum_ref[...] = jnp.sum(acc, axis=0, keepdims=True)[None]
    sq_ref[...] = jnp.sum(acc * acc, axis=0, keepdims=True)[None]


def _scale_shift_relu_kernel(y_ref, scale_ref, shift_ref, o_ref):
    # Folded batch-norm + ReLU: one FMA + one max per element.
    y = y_ref[...].astype(jnp.float32)
    o_ref[...] = jnp.maximum(y * scale_ref[...] + shift_ref[...], 0.0)


def _scale_shift_relu_pool_kernel(ipb, hw, y_ref, scale_ref, shift_ref,
                                  o_ref, pool_ref):
    # Folded BN + ReLU with the adaptive (1,1) avg-pool fused in.  Each grid
    # step handles `ipb` images (ipb*hw rows) so blocks stay (8,128)-aligned
    # and comfortably above the per-grid-step overhead break-even.
    y = y_ref[...].astype(jnp.float32)
    z = jnp.maximum(y * scale_ref[...] + shift_ref[...], 0.0)
    o_ref[...] = z
    pool_ref[...] = jnp.mean(z.reshape(ipb, hw, z.shape[-1]), axis=1)


# ---------------------------------------------------------------------------
# pallas_call wrappers
# ---------------------------------------------------------------------------
def _conv_matmul_stats(patches, w_mat, tm, nt, vmem_limit):
    Mp, K = patches.shape
    Cout = w_mat.shape[1]
    return pl.pallas_call(
        _conv_stats_kernel,
        out_shape=(jax.ShapeDtypeStruct((Mp, Cout), jnp.bfloat16),
                   jax.ShapeDtypeStruct((nt, 1, Cout), jnp.float32),
                   jax.ShapeDtypeStruct((nt, 1, Cout), jnp.float32)),
        grid=(nt,),
        in_specs=[pl.BlockSpec((tm, K), lambda i: (i, 0)),
                  pl.BlockSpec((K, Cout), lambda i: (0, 0))],   # resident
        out_specs=(pl.BlockSpec((tm, Cout), lambda i: (i, 0)),
                   pl.BlockSpec((1, 1, Cout), lambda i: (i, 0, 0)),
                   pl.BlockSpec((1, 1, Cout), lambda i: (i, 0, 0))),
        compiler_params=_cparams(1, vmem_limit),
    )(patches, w_mat)


def _bn_fold(psum, psq, m_total, gamma, beta):
    """Fold batch statistics + affine into per-channel scale/shift (tiny)."""
    s = jnp.sum(psum, axis=(0, 1))
    sq = jnp.sum(psq, axis=(0, 1))
    mean = s / m_total
    var = jnp.maximum(sq / m_total - mean * mean, 0.0)   # clamp cancellation
    inv = jax.lax.rsqrt(var + BN_EPS)
    scale = gamma * inv
    shift = beta - mean * scale
    return (scale.reshape(1, -1).astype(jnp.float32),
            shift.reshape(1, -1).astype(jnp.float32))


def _normalize_relu(y, scale, shift):
    vmem_limit, cap = _vmem_budget()
    M, C = y.shape
    tm, nt = _pick_m_tile(M, cap)
    Mp = tm * nt
    if Mp != M:
        y = jnp.pad(y, ((0, Mp - M), (0, 0)))
    return pl.pallas_call(
        _scale_shift_relu_kernel,
        out_shape=jax.ShapeDtypeStruct((Mp, C), jnp.float32),
        grid=(nt,),
        in_specs=[pl.BlockSpec((tm, C), lambda i: (i, 0)),
                  pl.BlockSpec((1, C), lambda i: (0, 0)),
                  pl.BlockSpec((1, C), lambda i: (0, 0))],
        out_specs=pl.BlockSpec((tm, C), lambda i: (i, 0)),
        compiler_params=_cparams(1, vmem_limit),
    )(y, scale, shift)


def _normalize_relu_pool(y, scale, shift, n, hw):
    """Folded BN + ReLU + fused (1,1) avg-pool.  y holds exactly n*hw rows."""
    vmem_limit, cap = _vmem_budget()
    M, C = y.shape
    ipb = None
    if n * hw <= max(cap, 16):
        ipb = n                                  # whole output in one block
    else:
        for cand in range((n // 8) * 8, 0, -8):  # keep blocks (8,128)-aligned
            if n % cand == 0 and cand * hw <= cap:
                ipb = cand
                break
    if ipb is None:
        # TODO(synk): very large images / awkward batch sizes fall back to an
        # unfused pool (XLA mean over the normalized output).
        z = _normalize_relu(y, scale, shift)[:M]
        return z, jnp.mean(z.reshape(n, hw, C), axis=1)

    rows = ipb * hw
    kern = functools.partial(_scale_shift_relu_pool_kernel, ipb, hw)
    return pl.pallas_call(
        kern,
        out_shape=(jax.ShapeDtypeStruct((M, C), jnp.float32),
                   jax.ShapeDtypeStruct((n, C), jnp.float32)),
        grid=(n // ipb,),
        in_specs=[pl.BlockSpec((rows, C), lambda i: (i, 0)),
                  pl.BlockSpec((1, C), lambda i: (0, 0)),
                  pl.BlockSpec((1, C), lambda i: (0, 0))],
        out_specs=(pl.BlockSpec((rows, C), lambda i: (i, 0)),
                   pl.BlockSpec((ipb, C), lambda i: (i, 0))),
        compiler_params=_cparams(1, vmem_limit),
    )(y, scale, shift)


# ---------------------------------------------------------------------------
# JAX-side glue (im2col, weight folding, layer driver)
# ---------------------------------------------------------------------------
def _im2col_nhwc(x_nhwc, K, S, P):
    """Channels-last patch extraction -> (N*Ho*Wo, K*K*C), plus (Ho, Wo).
    TODO(synk): still plain-JAX; in-kernel per-(kh,kw) tap matmuls on a
    VMEM-resident tile would remove the K*K HBM byte amplification."""
    N, H, W, C = x_nhwc.shape
    xp = jnp.pad(x_nhwc, ((0, 0), (P, P), (P, P), (0, 0)))
    Ho = (H + 2 * P - K) // S + 1
    Wo = (W + 2 * P - K) // S + 1
    taps = []
    for i in range(K):
        for j in range(K):
            taps.append(xp[:, i:i + S * (Ho - 1) + 1:S,
                           j:j + S * (Wo - 1) + 1:S, :])
    patches = jnp.stack(taps, axis=3)                  # (N, Ho, Wo, K*K, C)
    return patches.reshape(N * Ho * Wo, K * K * C), Ho, Wo


def _conv_pre_bn(x_nhwc, w_oihw, gamma, beta, K, S, P):
    """Pass A + stats fold.  Conv bias intentionally dropped (training-mode
    BN cancels it exactly).  Output channels are zero-padded to a multiple of
    128 so all downstream stores/loads are lane-dense."""
    vmem_limit, gen_cap = _vmem_budget()
    N = x_nhwc.shape[0]
    Cin_x = x_nhwc.shape[-1]
    Cout, Cin_w = w_oihw.shape[0], w_oihw.shape[1]
    cout_p = _round_up(Cout, _LANE)
    Kdim = K * K * Cin_x

    patches, Ho, Wo = _im2col_nhwc(x_nhwc.astype(jnp.bfloat16), K, S, P)
    M = N * Ho * Wo
    cap = min(gen_cap, max(16, vmem_limit // (8 * Kdim)))
    tm, nt = _pick_m_tile(M, cap)
    Mp = tm * nt
    if Mp != M:
        patches = jnp.pad(patches, ((0, Mp - M), (0, 0)))   # zero rows: stats-safe

    w = w_oihw
    if cout_p != Cout or Cin_x != Cin_w:
        # Zero-padded in-channels multiply zero-padded upstream activations;
        # zero-padded out-channels stay exactly zero through BN + ReLU.
        w = jnp.pad(w, ((0, cout_p - Cout), (0, Cin_x - Cin_w), (0, 0), (0, 0)))
    w_mat = (jnp.transpose(w, (2, 3, 1, 0))
             .reshape(Kdim, cout_p).astype(jnp.bfloat16))
    g = jnp.pad(gamma, (0, cout_p - Cout)) if cout_p != Cout else gamma
    b = jnp.pad(beta, (0, cout_p - Cout)) if cout_p != Cout else beta

    y, psum, psq = _conv_matmul_stats(patches, w_mat, tm, nt, vmem_limit)
    scale, shift = _bn_fold(psum, psq, M, g, b)
    return y, scale, shift, Ho, Wo, M


@jax.jit
def residual_encoder(x_nchw, params):
    N = x_nchw.shape[0]
    C1 = params["w1"].shape[0]
    C2 = params["w2"].shape[0]
    x_nhwc = jnp.transpose(x_nchw, (0, 2, 3, 1))

    # ---- layer 1: conv(k=6, s=2, p=2) + BN + ReLU ------------------------
    y1, s1, sh1, Ho1, Wo1, M1 = _conv_pre_bn(
        x_nhwc, params["w1"], params["g1"], params["be1"], K=6, S=2, P=2)
    out1_flat = _normalize_relu(y1, s1, sh1)
    if out1_flat.shape[0] != M1:
        out1_flat = out1_flat[:M1]
    C1p = out1_flat.shape[1]                     # 128 (zero-padded channels)
    out1_nhwc_p = out1_flat.reshape(N, Ho1, Wo1, C1p)

    # ---- layer 2: conv(k=4, s=2, p=1) + BN + ReLU + fused (1,1) pool -----
    y2, s2, sh2, Ho2, Wo2, M2 = _conv_pre_bn(
        out1_nhwc_p, params["w2"], params["g2"], params["be2"], K=4, S=2, P=1)
    if y2.shape[0] != M2:
        y2 = y2[:M2]
    out2_flat, pooled = _normalize_relu_pool(y2, s2, sh2, N, Ho2 * Wo2)

    # NCHW only for the returned tensors (module semantics); everything in
    # between stays channels-last / lane-dense.
    out1 = jnp.transpose(out1_nhwc_p[..., :C1], (0, 3, 1, 2))
    out2 = jnp.transpose(out2_flat[:, :C2].reshape(N, Ho2, Wo2, C2),
                         (0, 3, 1, 2))
    out = pooled[:, :C2].reshape(N, C2, 1, 1)
    return out1, out2, out


# ---------------------------------------------------------------------------
# Pure-JAX reference (for verification).  Keeps the conv bias to demonstrate
# that dropping it inside the kernels is correctness-preserving under
# training-mode BN.
# ---------------------------------------------------------------------------
def _ref_forward(x, p, quantize_matmul_inputs=False):
    if quantize_matmul_inputs:
        q = lambda a: a.astype(jnp.bfloat16).astype(jnp.float32)
    else:
        q = lambda a: a

    def layer(xin, w, b, g, be, stride, pad):
        y = jax.lax.conv_general_dilated(
            q(xin), q(w), window_strides=(stride, stride),
            padding=[(pad, pad), (pad, pad)],
            dimension_numbers=("NCHW", "OIHW", "NCHW"))
        y = y + b.reshape(1, -1, 1, 1)
        mean = jnp.mean(y, axis=(0, 2, 3), keepdims=True)
        var = jnp.mean((y - mean) ** 2, axis=(0, 2, 3), keepdims=True)
        y = (y - mean) * jax.lax.rsqrt(var + BN_EPS)
        y = y * g.reshape(1, -1, 1, 1) + be.reshape(1, -1, 1, 1)
        return jnp.maximum(y, 0.0)

    o1 = layer(x, p["w1"], p["b1"], p["g1"], p["be1"], 2, 2)
    o2 = layer(o1, p["w2"], p["b2"], p["g2"], p["be2"], 2, 1)
    return o1, o2, jnp.mean(o2, axis=(2, 3), keepdims=True)


# ---------------------------------------------------------------------------
if __name__ == "__main__":
    key = jax.random.PRNGKey(0)
    k = jax.random.split(key, 9)

    in_channels = 1
    params = {
        "w1": 0.1 * jax.random.normal(k[0], (64, in_channels, 6, 6), jnp.float32),
        "b1": 0.1 * jax.random.normal(k[1], (64,), jnp.float32),
        "g1": 1.0 + 0.1 * jax.random.normal(k[2], (64,), jnp.float32),
        "be1": 0.1 * jax.random.normal(k[3], (64,), jnp.float32),
        "w2": 0.05 * jax.random.normal(k[4], (128, 64, 4, 4), jnp.float32),
        "b2": 0.1 * jax.random.normal(k[5], (128,), jnp.float32),
        "g2": 1.0 + 0.1 * jax.random.normal(k[6], (128,), jnp.float32),
        "be2": 0.1 * jax.random.normal(k[7], (128,), jnp.float32),
    }

    x = jax.random.normal(k[8], (2, in_channels, 16, 16), jnp.float32)

    out1, out2, out = residual_encoder(x, params)
    jax.block_until_ready((out1, out2, out))

    assert out1.shape == (2, 64, 8, 8)
    assert out2.shape == (2, 128, 4, 4)
    assert out.shape == (2, 128, 1, 1)

    # Check vs a reference whose matmul inputs are quantized to bf16 (isolates
    # structural errors; remaining delta is the intentional bf16 storage of
    # the pre-BN intermediates).
    r1q, r2q, rq = _ref_forward(x, params, quantize_matmul_inputs=True)
    assert jnp.allclose(out1, r1q, atol=2e-2, rtol=2e-2)
    assert jnp.allclose(out2, r2q, atol=2e-2, rtol=2e-2)
    assert jnp.allclose(out, rq, atol=2e-2, rtol=2e-2)

    # Looser check vs the pure-f32 module forward (adds bf16 MXU-input rounding).
    r1, r2, r = _ref_forward(x, params, quantize_matmul_inputs=False)
    assert jnp.allclose(out1, r1, atol=5e-2, rtol=5e-2)
    assert jnp.allclose(out2, r2, atol=5e-2, rtol=5e-2)
    assert jnp.allclose(out, r, atol=5e-2, rtol=5e-2)

    print("KERNEL_OK")
</pallas_src>

<mosaic_0001>
module attributes {stable_mosaic.version = 11 : i64} {
  func.func @_scale_shift_relu_kernel(%arg0: i32, %arg1: memref<64x128xbf16, #tpu.memory_space<vmem>>, %arg2: memref<1x128xf32, #tpu.memory_space<vmem>>, %arg3: memref<1x128xf32, #tpu.memory_space<vmem>>, %arg4: memref<64x128xf32, #tpu.memory_space<vmem>>) attributes {dimension_semantics = [#tpu.dimension_semantics<parallel>], iteration_bounds = array<i64: 2>, scalar_prefetch = 0 : i64, scratch_operands = 0 : i64, tpu.core_type = #tpu.core_type<tc>, window_params = [{transform_indices = @transform_0, window_bounds = array<i64: 64, 128>}, {pipeline_mode = #tpu.pipeline_mode<synchronous>, transform_indices = @transform_1, window_bounds = array<i64: 1, 128>}, {pipeline_mode = #tpu.pipeline_mode<synchronous>, transform_indices = @transform_2, window_bounds = array<i64: 1, 128>}, {transform_indices = @transform_3, window_bounds = array<i64: 64, 128>}]} {
    %c0 = arith.constant 0 : index
    %c0_0 = arith.constant 0 : index
    %0 = vector.load %arg1[%c0, %c0_0] : memref<64x128xbf16, #tpu.memory_space<vmem>>, vector<64x128xbf16>
    %1 = arith.extf %0 : vector<64x128xbf16> to vector<64x128xf32>
    %c0_1 = arith.constant 0 : index
    %c0_2 = arith.constant 0 : index
    %2 = vector.load %arg2[%c0_1, %c0_2] : memref<1x128xf32, #tpu.memory_space<vmem>>, vector<1x128xf32>
    %3 = vector.broadcast %2 : vector<1x128xf32> to vector<64x128xf32>
    %4 = arith.mulf %1, %3 : vector<64x128xf32>
    %c0_3 = arith.constant 0 : index
    %c0_4 = arith.constant 0 : index
    %5 = vector.load %arg3[%c0_3, %c0_4] : memref<1x128xf32, #tpu.memory_space<vmem>>, vector<1x128xf32>
    %6 = vector.broadcast %5 : vector<1x128xf32> to vector<64x128xf32>
    %7 = arith.addf %4, %6 : vector<64x128xf32>
    %cst = arith.constant 0.000000e+00 : f32
    %8 = vector.broadcast %cst : f32 to vector<64x128xf32>
    %9 = arith.maximumf %7, %8 : vector<64x128xf32>
    %c0_5 = arith.constant 0 : index
    %c0_6 = arith.constant 0 : index
    %10 = vector.load %arg4[%c0_5, %c0_6] : memref<64x128xf32, #tpu.memory_space<vmem>>, vector<64x128xf32>
    tpu.vector_store %arg4[%c0_5, %c0_6], %9 {strides = array<i32>} : memref<64x128xf32, #tpu.memory_space<vmem>>, vector<64x128xf32>,
    return
  }
  func.func @transform_0(%arg0: i32) -> (i32, i32) {
    %c0_i32 = arith.constant 0 : i32
    %c0_i32_0 = arith.constant 0 : i32
    return %arg0, %c0_i32 : i32, i32
  }
  func.func @transform_1(%arg0: i32) -> (i32, i32) {
    %c0_i32 = arith.constant 0 : i32
    %c0_i32_0 = arith.constant 0 : i32
    %c0_i32_1 = arith.constant 0 : i32
    return %c0_i32, %c0_i32_0 : i32, i32
  }
  func.func @transform_2(%arg0: i32) -> (i32, i32) {
    %c0_i32 = arith.constant 0 : i32
    %c0_i32_0 = arith.constant 0 : i32
    %c0_i32_1 = arith.constant 0 : i32
    return %c0_i32, %c0_i32_0 : i32, i32
  }
  func.func @transform_3(%arg0: i32) -> (i32, i32) {
    %c0_i32 = arith.constant 0 : i32
    %c0_i32_0 = arith.constant 0 : i32
    return %arg0, %c0_i32 : i32, i32
  }
}

module attributes {stable_mosaic.version = 11 : i64} {
  func.func @_conv_stats_kernel(%arg0: i32, %arg1: memref<64x36xbf16, #tpu.memory_space<vmem>>, %arg2: memref<36x128xbf16, #tpu.memory_space<vmem>>, %arg3: memref<64x128xbf16, #tpu.memory_space<vmem>>, %arg4: memref<1x1x128xf32, #tpu.memory_space<vmem>>, %arg5: memref<1x1x128xf32, #tpu.memory_space<vmem>>) attributes {dimension_semantics = [#tpu.dimension_semantics<parallel>], iteration_bounds = array<i64: 2>, scalar_prefetch = 0 : i64, scratch_operands = 0 : i64, tpu.core_type = #tpu.core_type<tc>, window_params = [{transform_indices = @transform_0, window_bounds = array<i64: 64, 36>}, {pipeline_mode = #tpu.pipeline_mode<synchronous>, transform_indices = @transform_1, window_bounds = array<i64: 36, 128>}, {transform_indices = @transform_2, window_bounds = array<i64: 64, 128>}, {transform_indices = @transform_3, window_bounds = array<i64: 1, 1, 128>}, {transform_indices = @transform_4, window_bounds = array<i64: 1, 1, 128>}]} {
    %c0 = arith.constant 0 : index
    %c0_0 = arith.constant 0 : index
    %0 = vector.load %arg1[%c0, %c0_0] : memref<64x36xbf16, #tpu.memory_space<vmem>>, vector<64x36xbf16>
    %c0_1 = arith.constant 0 : index
    %c0_2 = arith.constant 0 : index
    %1 = vector.load %arg2[%c0_1, %c0_2] : memref<36x128xbf16, #tpu.memory_space<vmem>>, vector<36x128xbf16>
    %cst = arith.constant dense<0.000000e+00> : vector<64x128xf32>
    %2 = tpu.matmul %0, %1, %cst {dimension_numbers = #tpu.dot_dimension_numbers<[1], [0], [0], [1], [0, 0, 1, 1], [], []>} : vector<64x36xbf16>, vector<36x128xbf16>, vector<64x128xf32> -> vector<64x128xf32>
    %3 = arith.truncf %2 : vector<64x128xf32> to vector<64x128xbf16>
    %c0_3 = arith.constant 0 : index
    %c0_4 = arith.constant 0 : index
    %4 = vector.load %arg3[%c0_3, %c0_4] : memref<64x128xbf16, #tpu.memory_space<vmem>>, vector<64x128xbf16>
    tpu.vector_store %arg3[%c0_3, %c0_4], %3 {strides = array<i32>} : memref<64x128xbf16, #tpu.memory_space<vmem>>, vector<64x128xbf16>,
    %cst_5 = arith.constant dense<0.000000e+00> : vector<128xf32>
    %5 = vector.multi_reduction <add>, %2, %cst_5 [0] : vector<64x128xf32> to vector<128xf32>
    %6 = vector.shape_cast %5 : vector<128xf32> to vector<1x128xf32>
    %7 = vector.shape_cast %6 : vector<1x128xf32> to vector<1x1x128xf32>
    %c0_6 = arith.constant 0 : index
    %c0_7 = arith.constant 0 : index
    %c0_8 = arith.constant 0 : index
    %8 = vector.load %arg4[%c0_6, %c0_7, %c0_8] : memref<1x1x128xf32, #tpu.memory_space<vmem>>, vector<1x1x128xf32>
    tpu.vector_store %arg4[%c0_6, %c0_7, %c0_8], %7 {strides = array<i32>} : memref<1x1x128xf32, #tpu.memory_space<vmem>>, vector<1x1x128xf32>,
    %9 = arith.mulf %2, %2 : vector<64x128xf32>
    %cst_9 = arith.constant dense<0.000000e+00> : vector<128xf32>
    %10 = vector.multi_reduction <add>, %9, %cst_9 [0] : vector<64x128xf32> to vector<128xf32>
    %11 = vector.shape_cast %10 : vector<128xf32> to vector<1x128xf32>
    %12 = vector.shape_cast %11 : vector<1x128xf32> to vector<1x1x128xf32>
    %c0_10 = arith.constant 0 : index
    %c0_11 = arith.constant 0 : index
    %c0_12 = arith.constant 0 : index
    %13 = vector.load %arg5[%c0_10, %c0_11, %c0_12] : memref<1x1x128xf32, #tpu.memory_space<vmem>>, vector<1x1x128xf32>
    tpu.vector_store %arg5[%c0_10, %c0_11, %c0_12], %12 {strides = array<i32>} : memref<1x1x128xf32, #tpu.memory_space<vmem>>, vector<1x1x128xf32>,
    return
  }
  func.func @transform_0(%arg0: i32) -> (i32, i32) {
    %c0_i32 = arith.constant 0 : i32
    %c0_i32_0 = arith.constant 0 : i32
    return %arg0, %c0_i32 : i32, i32
  }
  func.func @transform_1(%arg0: i32) -> (i32, i32) {
    %c0_i32 = arith.constant 0 : i32
    %c0_i32_0 = arith.constant 0 : i32
    %c0_i32_1 = arith.constant 0 : i32
    return %c0_i32, %c0_i32_0 : i32, i32
  }
  func.func @transform_2(%arg0: i32) -> (i32, i32) {
    %c0_i32 = arith.constant 0 : i32
    %c0_i32_0 = arith.constant 0 : i32
    return %arg0, %c0_i32 : i32, i32
  }
  func.func @transform_3(%arg0: i32) -> (i32, i32, i32) {
    %c0_i32 = arith.constant 0 : i32
    %c0_i32_0 = arith.constant 0 : i32
    %c0_i32_1 = arith.constant 0 : i32
    return %arg0, %c0_i32, %c0_i32_0 : i32, i32, i32
  }
  func.func @transform_4(%arg0: i32) -> (i32, i32, i32) {
    %c0_i32 = arith.constant 0 : i32
    %c0_i32_0 = arith.constant 0 : i32
    %c0_i32_1 = arith.constant 0 : i32
    return %arg0, %c0_i32, %c0_i32_0 : i32, i32, i32
  }
}

module attributes {stable_mosaic.version = 11 : i64} {
  func.func @_conv_stats_kernel(%arg0: i32, %arg1: memref<16x2048xbf16, #tpu.memory_space<vmem>>, %arg2: memref<2048x128xbf16, #tpu.memory_space<vmem>>, %arg3: memref<16x128xbf16, #tpu.memory_space<vmem>>, %arg4: memref<1x1x128xf32, #tpu.memory_space<vmem>>, %arg5: memref<1x1x128xf32, #tpu.memory_space<vmem>>) attributes {dimension_semantics = [#tpu.dimension_semantics<parallel>], iteration_bounds = array<i64: 2>, scalar_prefetch = 0 : i64, scratch_operands = 0 : i64, tpu.core_type = #tpu.core_type<tc>, window_params = [{transform_indices = @transform_0, window_bounds = array<i64: 16, 2048>}, {pipeline_mode = #tpu.pipeline_mode<synchronous>, transform_indices = @transform_1, window_bounds = array<i64: 2048, 128>}, {transform_indices = @transform_2, window_bounds = array<i64: 16, 128>}, {transform_indices = @transform_3, window_bounds = array<i64: 1, 1, 128>}, {transform_indices = @transform_4, window_bounds = array<i64: 1, 1, 128>}]} {
    %c0 = arith.constant 0 : index
    %c0_0 = arith.constant 0 : index
    %0 = vector.load %arg1[%c0, %c0_0] : memref<16x2048xbf16, #tpu.memory_space<vmem>>, vector<16x2048xbf16>
    %c0_1 = arith.constant 0 : index
    %c0_2 = arith.constant 0 : index
    %1 = vector.load %arg2[%c0_1, %c0_2] : memref<2048x128xbf16, #tpu.memory_space<vmem>>, vector<2048x128xbf16>
    %cst = arith.constant dense<0.000000e+00> : vector<16x128xf32>
    %2 = tpu.matmul %0, %1, %cst {dimension_numbers = #tpu.dot_dimension_numbers<[1], [0], [0], [1], [0, 0, 1, 1], [], []>} : vector<16x2048xbf16>, vector<2048x128xbf16>, vector<16x128xf32> -> vector<16x128xf32>
    %3 = arith.truncf %2 : vector<16x128xf32> to vector<16x128xbf16>
    %c0_3 = arith.constant 0 : index
    %c0_4 = arith.constant 0 : index
    %4 = vector.load %arg3[%c0_3, %c0_4] : memref<16x128xbf16, #tpu.memory_space<vmem>>, vector<16x128xbf16>
    tpu.vector_store %arg3[%c0_3, %c0_4], %3 {strides = array<i32>} : memref<16x128xbf16, #tpu.memory_space<vmem>>, vector<16x128xbf16>,
    %cst_5 = arith.constant dense<0.000000e+00> : vector<128xf32>
    %5 = vector.multi_reduction <add>, %2, %cst_5 [0] : vector<16x128xf32> to vector<128xf32>
    %6 = vector.shape_cast %5 : vector<128xf32> to vector<1x128xf32>
    %7 = vector.shape_cast %6 : vector<1x128xf32> to vector<1x1x128xf32>
    %c0_6 = arith.constant 0 : index
    %c0_7 = arith.constant 0 : index
    %c0_8 = arith.constant 0 : index
    %8 = vector.load %arg4[%c0_6, %c0_7, %c0_8] : memref<1x1x128xf32, #tpu.memory_space<vmem>>, vector<1x1x128xf32>
    tpu.vector_store %arg4[%c0_6, %c0_7, %c0_8], %7 {strides = array<i32>} : memref<1x1x128xf32, #tpu.memory_space<vmem>>, vector<1x1x128xf32>,
    %9 = arith.mulf %2, %2 : vector<16x128xf32>
    %cst_9 = arith.constant dense<0.000000e+00> : vector<128xf32>
    %10 = vector.multi_reduction <add>, %9, %cst_9 [0] : vector<16x128xf32> to vector<128xf32>
    %11 = vector.shape_cast %10 : vector<128xf32> to vector<1x128xf32>
    %12 = vector.shape_cast %11 : vector<1x128xf32> to vector<1x1x128xf32>
    %c0_10 = arith.constant 0 : index
    %c0_11 = arith.constant 0 : index
    %c0_12 = arith.constant 0 : index
    %13 = vector.load %arg5[%c0_10, %c0_11, %c0_12] : memref<1x1x128xf32, #tpu.memory_space<vmem>>, vector<1x1x128xf32>
    tpu.vector_store %arg5[%c0_10, %c0_11, %c0_12], %12 {strides = array<i32>} : memref<1x1x128xf32, #tpu.memory_space<vmem>>, vector<1x1x128xf32>,
    return
  }
  func.func @transform_0(%arg0: i32) -> (i32, i32) {
    %c0_i32 = arith.constant 0 : i32
    %c0_i32_0 = arith.constant 0 : i32
    return %arg0, %c0_i32 : i32, i32
  }
  func.func @transform_1(%arg0: i32) -> (i32, i32) {
    %c0_i32 = arith.constant 0 : i32
    %c0_i32_0 = arith.constant 0 : i32
    %c0_i32_1 = arith.constant 0 : i32
    return %c0_i32, %c0_i32_0 : i32, i32
  }
  func.func @transform_2(%arg0: i32) -> (i32, i32) {
    %c0_i32 = arith.constant 0 : i32
    %c0_i32_0 = arith.constant 0 : i32
    return %arg0, %c0_i32 : i32, i32
  }
  func.func @transform_3(%arg0: i32) -> (i32, i32, i32) {
    %c0_i32 = arith.constant 0 : i32
    %c0_i32_0 = arith.constant 0 : i32
    %c0_i32_1 = arith.constant 0 : i32
    return %arg0, %c0_i32, %c0_i32_0 : i32, i32, i32
  }
  func.func @transform_4(%arg0: i32) -> (i32, i32, i32) {
    %c0_i32 = arith.constant 0 : i32
    %c0_i32_0 = arith.constant 0 : i32
    %c0_i32_1 = arith.constant 0 : i32
    return %arg0, %c0_i32, %c0_i32_0 : i32, i32, i32
  }
}

module attributes {stable_mosaic.version = 11 : i64} {
  func.func @_scale_shift_relu_pool_kernel(%arg0: i32, %arg1: memref<32x128xbf16, #tpu.memory_space<vmem>>, %arg2: memref<1x128xf32, #tpu.memory_space<vmem>>, %arg3: memref<1x128xf32, #tpu.memory_space<vmem>>, %arg4: memref<32x128xf32, #tpu.memory_space<vmem>>, %arg5: memref<2x128xf32, #tpu.memory_space<vmem>>) attributes {dimension_semantics = [#tpu.dimension_semantics<parallel>], iteration_bounds = array<i64: 1>, scalar_prefetch = 0 : i64, scratch_operands = 0 : i64, tpu.core_type = #tpu.core_type<tc>, window_params = [{transform_indices = @transform_0, window_bounds = array<i64: 32, 128>}, {pipeline_mode = #tpu.pipeline_mode<synchronous>, transform_indices = @transform_1, window_bounds = array<i64: 1, 128>}, {pipeline_mode = #tpu.pipeline_mode<synchronous>, transform_indices = @transform_2, window_bounds = array<i64: 1, 128>}, {transform_indices = @transform_3, window_bounds = array<i64: 32, 128>}, {transform_indices = @transform_4, window_bounds = array<i64: 2, 128>}]} {
    %c0 = arith.constant 0 : index
    %c0_0 = arith.constant 0 : index
    %0 = vector.load %arg1[%c0, %c0_0] : memref<32x128xbf16, #tpu.memory_space<vmem>>, vector<32x128xbf16>
    %1 = arith.extf %0 : vector<32x128xbf16> to vector<32x128xf32>
    %c0_1 = arith.constant 0 : index
    %c0_2 = arith.constant 0 : index
    %2 = vector.load %arg2[%c0_1, %c0_2] : memref<1x128xf32, #tpu.memory_space<vmem>>, vector<1x128xf32>
    %3 = vector.broadcast %2 : vector<1x128xf32> to vector<32x128xf32>
    %4 = arith.mulf %1, %3 : vector<32x128xf32>
    %c0_3 = arith.constant 0 : index
    %c0_4 = arith.constant 0 : index
    %5 = vector.load %arg3[%c0_3, %c0_4] : memref<1x128xf32, #tpu.memory_space<vmem>>, vector<1x128xf32>
    %6 = vector.broadcast %5 : vector<1x128xf32> to vector<32x128xf32>
    %7 = arith.addf %4, %6 : vector<32x128xf32>
    %cst = arith.constant 0.000000e+00 : f32
    %8 = vector.broadcast %cst : f32 to vector<32x128xf32>
    %9 = arith.maximumf %7, %8 : vector<32x128xf32>
    %c0_5 = arith.constant 0 : index
    %c0_6 = arith.constant 0 : index
    %10 = vector.load %arg4[%c0_5, %c0_6] : memref<32x128xf32, #tpu.memory_space<vmem>>, vector<32x128xf32>
    tpu.vector_store %arg4[%c0_5, %c0_6], %9 {strides = array<i32>} : memref<32x128xf32, #tpu.memory_space<vmem>>, vector<32x128xf32>,
    %11 = vector.shape_cast %9 : vector<32x128xf32> to vector<2x16x128xf32>
    %cst_7 = arith.constant dense<0.000000e+00> : vector<2x128xf32>
    %12 = vector.multi_reduction <add>, %11, %cst_7 [1] : vector<2x16x128xf32> to vector<2x128xf32>
    %cst_8 = arith.constant 1.600000e+01 : f32
    %13 = vector.broadcast %cst_8 : f32 to vector<2x128xf32>
    %14 = arith.divf %12, %13 : vector<2x128xf32>
    %c0_9 = arith.constant 0 : index
    %c0_10 = arith.constant 0 : index
    %15 = vector.load %arg5[%c0_9, %c0_10] : memref<2x128xf32, #tpu.memory_space<vmem>>, vector<2x128xf32>
    tpu.vector_store %arg5[%c0_9, %c0_10], %14 {strides = array<i32>} : memref<2x128xf32, #tpu.memory_space<vmem>>, vector<2x128xf32>,
    return
  }
  func.func @transform_0(%arg0: i32) -> (i32, i32) {
    %c0_i32 = arith.constant 0 : i32
    %c0_i32_0 = arith.constant 0 : i32
    return %arg0, %c0_i32 : i32, i32
  }
  func.func @transform_1(%arg0: i32) -> (i32, i32) {
    %c0_i32 = arith.constant 0 : i32
    %c0_i32_0 = arith.constant 0 : i32
    %c0_i32_1 = arith.constant 0 : i32
    return %c0_i32, %c0_i32_0 : i32, i32
  }
  func.func @transform_2(%arg0: i32) -> (i32, i32) {
    %c0_i32 = arith.constant 0 : i32
    %c0_i32_0 = arith.constant 0 : i32
    %c0_i32_1 = arith.constant 0 : i32
    return %c0_i32, %c0_i32_0 : i32, i32
  }
  func.func @transform_3(%arg0: i32) -> (i32, i32) {
    %c0_i32 = arith.constant 0 : i32
    %c0_i32_0 = arith.constant 0 : i32
    return %arg0, %c0_i32 : i32, i32
  }
  func.func @transform_4(%arg0: i32) -> (i32, i32) {
    %c0_i32 = arith.constant 0 : i32
    %c0_i32_0 = arith.constant 0 : i32
    return %arg0, %c0_i32 : i32, i32
  }
}

</mosaic_0001>

<bundles_post_ra>
// kernel: residual_encoder.5
= control target key start
LH: loop header
LB: loop body
LE: loop exit
PB: predicated region body
PF: predicated region fallthrough
CT: control target
= control target key end

     0   :  { %s360_s12 = smov 0   ;;  %s387_s0 = inlined_call_operand.vmem [shape: bf16[128,128], index: 0, kind: input, shape index: {}]   ;;  %s388_s1 = inlined_call_operand.vmem [shape: f32[1,128], index: 1, kind: input, shape index: {}]   ;;  %s389_s2 = inlined_call_operand.vmem [shape: f32[1,128], index: 2, kind: input, shape index: {}]   ;;  %s390_s3 = inlined_call_operand.vmem [shape: f32[128,128], index: 3, kind: output, shape index: {}]  }
   0x1 LB: > { %s292_s13 = sadd.s32 4294967295, %s338_s12   ;;  %p296_p0 = scmp.ge.s32.totalorder %s338_s12, 1  ;;  %s338_s12 = sphi %s360_s12, %s13_s12  }
   0x2   : > { %p138_p1 = scmp.lt.s32.totalorder %s338_s12, 3 }
   0x4   : > { %p139_p2 = pnand %p296_p0, %p138_p1 }
   0x5   : > { %s297_s14 = sshll.u32 (!%p139_p2), %s292_s13, 3  ;;  %v301_v0 = vld [vmem:[%s388_s1] ss:$0 sm:$0xff] (!%p139_p2) }
   0x6   : > { %142 = sbr.rel (%p139_p2) target bundleno = 29 (0x1d), region = 32  ;;  %p163_p3 = scmp.lt.s32.totalorder (!%p139_p2), %s297_s14, 15  ;;  %v302_v9 = vld [vmem:[%s389_s2] ss:$0 sm:$0xff] (!%p139_p2) }
   0xd   : > { %s392_s14 = smov (!%p163_p3, %s297_s14), 15 }
   0xe   : > { %s298_s15 = sshll.u32 %s392_s14, 2  ;;  %s300_s23 = sshll.u32 %s392_s14, 3 }
   0xf   : > { %s166_s18 = scalar_lea.vmem %s387_s0, %s298_s15  ;;  %s172_s26 = scalar_lea.vmem %s390_s3, %s300_s23 }
  0x10   : > { %v306_v1 = vld [vmem:[%s166_s18] sm:$0xff]   ;;  %v321_v2 = vld [vmem:[%s166_s18 + $0x8] sm:$0xff]   ;;  %v322_v3 = vld [vmem:[%s166_s18 + $0x10] sm:$0xff]  }
  0x11   : > { %v307_v4 = vunpack.c.l.bf16 %v306_v1  ;;  %v308_v5 = vunpack.c.h.bf16 %v306_v1  ;;  %v311_v6 = vunpack.c.l.bf16 %v321_v2  ;;  %v312_v7 = vunpack.c.h.bf16 %v321_v2  ;;  %v323_v8 = vld [vmem:[%s166_s18 + $0x18] sm:$0xff]  }
  0x12   : > { %v315_v10 = vunpack.c.l.bf16 %v322_v3  ;;  %v316_v11 = vunpack.c.h.bf16 %v322_v3  ;;  %v319_v12 = vunpack.c.l.bf16 %v323_v8  ;;  %v320_v13 = vunpack.c.h.bf16 %v323_v8 }
  0x13   : > { %v197_v14 = vmul.f32 %v307_v4, %v301_v0  ;;  %v198_v15 = vmul.f32 %v308_v5, %v301_v0  ;;  %v199_v16 = vmul.f32 %v311_v6, %v301_v0  ;;  %v200_v17 = vmul.f32 %v312_v7, %v301_v0 }
  0x14   : > { %v201_v18 = vmul.f32 %v315_v10, %v301_v0  ;;  %v202_v19 = vmul.f32 %v316_v11, %v301_v0  ;;  %v203_v20 = vmul.f32 %v319_v12, %v301_v0  ;;  %v204_v21 = vmul.f32 %v320_v13, %v301_v0 }
  0x15   : > { %v212_v22 = vadd.f32 %v302_v9, %v197_v14  ;;  %v213_v23 = vadd.f32 %v302_v9, %v198_v15  ;;  %v214_v24 = vadd.f32 %v302_v9, %v199_v16  ;;  %v215_v25 = vadd.f32 %v302_v9, %v200_v17 }
  0x16   : > { %v216_v26 = vadd.f32 %v302_v9, %v201_v18  ;;  %v217_v27 = vadd.f32 %v302_v9, %v202_v19  ;;  %v218_v28 = vadd.f32 %v302_v9, %v203_v20  ;;  %v219_v29 = vadd.f32 %v302_v9, %v204_v21 }
  0x17   : > { %v220_v30 = vmax.f32 %v212_v22, 0.0  ;;  %v221_v31 = vmax.f32 %v213_v23, 0.0  ;;  %v222_v32 = vmax.f32 %v214_v24, 0.0  ;;  %v223_v33 = vmax.f32 %v215_v25, 0.0 }
  0x18   : > { %v224_v34 = vmax.f32 %v216_v26, 0.0  ;;  %v225_v35 = vmax.f32 %v217_v27, 0.0  ;;  %v226_v36 = vmax.f32 %v218_v28, 0.0  ;;  %v227_v37 = vmax.f32 %v219_v29, 0.0 }
  0x19   : > { %228 = vst [vmem:[%s172_s26] sm:$0xff] %v220_v30  ;;  %229 = vst [vmem:[%s172_s26 + $0x8] sm:$0xff] %v221_v31 }
  0x1a   : > { %230 = vst [vmem:[%s172_s26 + $0x10] sm:$0xff] %v222_v32  ;;  %231 = vst [vmem:[%s172_s26 + $0x18] sm:$0xff] %v223_v33 }
  0x1b   : > { %232 = vst [vmem:[%s172_s26 + $0x20] sm:$0xff] %v224_v34  ;;  %233 = vst [vmem:[%s172_s26 + $0x28] sm:$0xff] %v225_v35 }
  0x1c   : > { %234 = vst [vmem:[%s172_s26 + $0x30] sm:$0xff] %v226_v36  ;;  %235 = vst [vmem:[%s172_s26 + $0x38] sm:$0xff] %v227_v37 }
  0x1d PF: > { %s13_s12 = sadd.s32 1, %s338_s12  }
  0x1e   : > { %p10_p4 = scmp.ge.s32.totalorder %s13_s12, 4  }
  0x20   :  { %12 = sbr.rel (!%p10_p4) target bundleno = 1 (0x1), region = 62 }

// kernel: residual_encoder.4
= control target key start
LH: loop header
LB: loop body
LE: loop exit
PB: predicated region body
PF: predicated region fallthrough
CT: control target
= control target key end

     0   :  { %s669_s15 = smov 0   ;;  %s706_s0 = inlined_call_operand.vmem [shape: bf16[128,36], index: 0, kind: input, shape index: {}]   ;;  %s707_s1 = inlined_call_operand.vmem [shape: bf16[36,128], index: 1, kind: input, shape index: {}]   ;;  %s708_s2 = inlined_call_operand.vmem [shape: bf16[128,128], index: 2, kind: output, shape index: {0}]   ;;  %s709_s3 = inlined_call_operand.vmem [shape: f32[2,1,128], index: 3, kind: output, shape index: {1}]   ;;  %s710_s4 = inlined_call_operand.vmem [shape: f32[2,1,128], index: 4, kind: output, shape index: {2}]  }
   0x1 LB: > { %s675_s16 = sadd.s32 4294967295, %s642_s15   ;;  %p535_p0 = scmp.ge.s32.totalorder %s642_s15, 1  ;;  %s642_s15 = sphi %s669_s15, %s15_s15  }
   0x2   : > { %p168_p1 = scmp.lt.s32.totalorder %s642_s15, 3 }
   0x4   : > { %p169_p2 = pnand %p535_p0, %p168_p1 }
   0x5   : > { %v629_v0 = vld [vmem:[%s707_s1] sm:$0xff] (!%p169_p2)   ;;  %v630_v1 = vld [vmem:[%s707_s1 + $0x8] sm:$0xff] (!%p169_p2)   ;;  %s536_s21 = sshll.u32 (!%p169_p2), %s675_s16, 3  ;;  %v631_v2 = vld [vmem:[%s707_s1 + $0x10] ss:$0 sps:$4 sm:$0x33] (!%p169_p2)  }
   0x6   : > { %172 = sbr.rel (%p169_p2) target bundleno = 262 (0x106), region = 28  ;;  %599 = vmatprep.subr.bf16.mxu0 (!%p169_p2), %v629_v0  ;;  %613 = vmatprep.subr.bf16.mxu1 (!%p169_p2), %v629_v0  ;;  %p201_p3 = scmp.lt.s32.totalorder (!%p169_p2), %s536_s21, 15  ;;  %vm280_vm0 = vcmask (!%p169_p2), 1041408   ;;  %vm267_vm1 = vcmask (!%p169_p2), 293888  }
   0x7   : > { %600 = vmatpush3.bf16.msra.mxu0 (!%p169_p2), %v629_v0  ;;  %616 = vmatpush3.bf16.msra.mxu1 (!%p169_p2), %v629_v0  ;;  %v282_v3 = vsel (!%p169_p2), %vm280_vm0, %v631_v2, 0  ;;  %p212_p4 = scmp.lt.s32.totalorder (!%p169_p2), %s675_s16, 1 }
   0x8   : > { %601 = vmatprep.subr.bf16.mxu0 (!%p169_p2), %v630_v1  ;;  %614 = vmatprep.subr.bf16.mxu1 (!%p169_p2), %v630_v1 }
   0xb   : > { %602 = vmatpush3.bf16.msra.mxu0 (!%p169_p2), %v630_v1  ;;  %617 = vmatpush3.bf16.msra.mxu1 (!%p169_p2), %v630_v1 }
   0xc   : > { %619 = vmatprep.subr.msk.bf16.mxu0 (!%p169_p2), %vm280_vm0, %v631_v2  ;;  %620 = vmatprep.subr.msk.bf16.mxu1 (!%p169_p2), %vm280_vm0, %v631_v2 }
   0xd   : > { %s712_s21 = smov (!%p201_p3, %s536_s21), 15  ;;  %s714_s16 = smov (!%p212_p4, %s675_s16), 1 }
   0xe   : > { %s537_s24 = sshll.u32 %s712_s21, 2  ;;  %s214_s7 = scalar_lea.vmem %s709_s3, %s714_s16 }
   0xf   : > { %s204_s27 = scalar_lea.vmem %s706_s0, %s537_s24  ;;  %604 = vmatpush3.bf16.msra.mxu0 %v282_v3  ;;  %618 = vmatpush3.bf16.msra.mxu1 %v282_v3  ;;  %s210_s30 = scalar_lea.vmem %s708_s2, %s537_s24 }
  0x10   : > { %v632_v4 = vld [vmem:[%s204_s27] sm:$0xff]   ;;  %v633_v5 = vld [vmem:[%s204_s27 + $0x8] sm:$0xff]   ;;  %v634_v6 = vld [vmem:[%s204_s27 + $0x10] sm:$0xff]   ;;  %s217_s10 = scalar_lea.vmem %s710_s4, %s714_s16 }
  0x11   : > { %605 = vmatprep.mubr.msk.bf16.mxu0 %vm267_vm1, %v632_v4  ;;  %v635_v7 = vld [vmem:[%s204_s27 + $0x18] sm:$0xff]   ;;  %609 = vmatprep.mubr.msk.bf16.mxu1 %vm267_vm1, %v634_v6 }
  0x12   : > { %606 = vmatmul.mubr.msk.bf16.vlgmr.msra.gmra.mrb[0].mxu0 %vm267_vm1, %v633_v5  ;;  %610 = vmatmul.mubr.msk.bf16.vlgmr.msra.gmra.mrb[0].mxu1 %vm267_vm1, %v635_v7 }
  0xe5   : > { %v607_v8 = vpop.f32.mrb[0].mxu0  ;;  %v611_v9 = vpop.f32.mrb[0].mxu1 }
  0xe6   : > { %v318_v10 = vpop.f32.mrb[1].mxu0  ;;  %v334_v11 = vpop.f32.mrb[1].mxu1  ;;  %v405_v23 = vmul.f32 %v607_v8, %v607_v8  ;;  %v409_v35 = vmul.f32 %v611_v9, %v611_v9 }
  0xe7   : > { %v608_v12 = vpop.f32.mrb[2].mxu0  ;;  %v612_v13 = vpop.f32.mrb[2].mxu1  ;;  %v403_v14 = vmul.f32 %v318_v10, %v318_v10  ;;  %v407_v29 = vmul.f32 %v334_v11, %v334_v11 }
  0xe8   : > { %v577_v15 = vpack.c.bf16 %v608_v12, %v607_v8  ;;  %v321_v16 = vpop.f32.mrb[3].mxu0  ;;  %v587_v17 = vpack.c.bf16 %v612_v13, %v611_v9  ;;  %v337_v18 = vpop.f32.mrb[3].mxu1  ;;  %v406_v26 = vmul.f32 %v608_v12, %v608_v12  ;;  %v410_v38 = vmul.f32 %v612_v13, %v612_v13 }
  0xe9   : > { %v572_v19 = vpack.c.bf16 %v321_v16, %v318_v10  ;;  %v389_v20 = vadd.f32 %v321_v16, %v318_v10  ;;  %v404_v21 = vmul.f32 %v321_v16, %v321_v16  ;;  %v582_v22 = vpack.c.bf16 %v337_v18, %v334_v11 }
  0xea   : > { %589 = vst [vmem:[%s210_s30 + $0x8] sm:$0xff] %v577_v15   ;;  %591 = vst [vmem:[%s210_s30 + $0x18] sm:$0xff] %v587_v17   ;;  %v408_v34 = vmul.f32 %v337_v18, %v337_v18 }
  0xeb   : > { %573 = vst [vmem:[%s210_s30] sm:$0xff] %v572_v19   ;;  %v390_v24 = vadd.f32 %v607_v8, %v389_v20  ;;  %v411_v25 = vadd.f32 %v404_v21, %v403_v14  ;;  %590 = vst [vmem:[%s210_s30 + $0x10] sm:$0xff] %v582_v22  }
  0xed   : > { %v412_v27 = vadd.f32 %v411_v25, %v405_v23  ;;  %v391_v28 = vadd.f32 %v608_v12, %v390_v24 }
  0xef   : > { %v392_v30 = vadd.f32 %v391_v28, %v334_v11  ;;  %v413_v31 = vadd.f32 %v412_v27, %v406_v26 }
  0xf1   : > { %v414_v32 = vadd.f32 %v413_v31, %v407_v29  ;;  %v393_v33 = vadd.f32 %v392_v30, %v337_v18 }
  0xf3   : > { %v394_v36 = vadd.f32 %v611_v9, %v393_v33  ;;  %v415_v37 = vadd.f32 %v414_v32, %v408_v34 }
  0xf5   : > { %v395_v39 = vadd.f32 %v612_v13, %v394_v36  ;;  %v416_v40 = vadd.f32 %v415_v37, %v409_v35 }
  0xf7   : > { %v396_v41 = vrot.slane %v395_v39, 4  ;;  %v417_v42 = vadd.f32 %v416_v40, %v410_v38 }
  0xf9   : > { %v397_v43 = vadd.f32 %v396_v41, %v395_v39  ;;  %v418_v44 = vrot.slane %v417_v42, 4 }
  0xfb   : > { %v398_v45 = vrot.slane %v397_v43, 2  ;;  %v419_v46 = vadd.f32 %v418_v44, %v417_v42 }
  0xfd   : > { %v399_v47 = vadd.f32 %v398_v45, %v397_v43  ;;  %v420_v48 = vrot.slane %v419_v46, 2 }
  0xff   : > { %v400_v49 = vrot.slane %v399_v47, 1  ;;  %v421_v50 = vadd.f32 %v420_v48, %v419_v46 }
 0x101   : > { %v401_v51 = vadd.f32 %v400_v49, %v399_v47  ;;  %v422_v52 = vrot.slane %v421_v50, 1 }
 0x103   : > { %402 = vst [vmem:[%s214_s7] sm:$0x1] %v401_v51  ;;  %v423_v53 = vadd.f32 %v422_v52, %v421_v50 }
 0x105   : > { %424 = vst [vmem:[%s217_s10] sm:$0x1] %v423_v53 }
 0x106 PF: > { %s15_s15 = sadd.s32 1, %s642_s15  }
 0x107   : > { %p12_p5 = scmp.ge.s32.totalorder %s15_s15, 4  }
 0x109   :  { %14 = sbr.rel (!%p12_p5) target bundleno = 1 (0x1), region = 82 }

// kernel: residual_encoder.7
= control target key start
LH: loop header
LB: loop body
LE: loop exit
PB: predicated region body
PF: predicated region fallthrough
CT: control target
= control target key end

     0   :  { %10 = vsyncpa [#allocation3], 0  ;;  %s237_s0 = inlined_call_operand.vmem [shape: bf16[32,128], index: 0, kind: input, shape index: {}]   ;;  %s238_s1 = inlined_call_operand.vmem [shape: f32[1,128], index: 1, kind: input, shape index: {}]   ;;  %s239_s2 = inlined_call_operand.vmem [shape: f32[1,128], index: 2, kind: input, shape index: {}]   ;;  %s240_s3 = inlined_call_operand.hbm [shape: f32[32,128], index: 3, kind: output, shape index: {0}]   ;;  %s241_s4 = inlined_call_operand.hbm [shape: f32[2,128], index: 4, kind: output, shape index: {1}]  }
   0x1   :  { %v112_v0 = vld [vmem:[%s237_s0] sm:$0xff]   ;;  %v119_v4 = vld [vmem:[%s237_s0 + $0x8] sm:$0xff]  }
   0x2   :  { %v109_v1 = vld [vmem:[%s238_s1] ss:$0 sm:$0xff]  ;;  %v113_v2 = vunpack.c.l.bf16 %v112_v0  ;;  %v114_v3 = vunpack.c.h.bf16 %v112_v0 }
   0x3   :  { %11 = vsyncpa [#allocation5], 0  ;;  %v110_v5 = vld [vmem:[%s239_s2] ss:$0 sm:$0xff]  ;;  %v117_v6 = vunpack.c.l.bf16 %v119_v4  ;;  %v118_v7 = vunpack.c.h.bf16 %v119_v4  ;;  %s172_s1 = smov [#allocation2]  }
   0x4   :  { %v33_v8 = vmul.f32 %v113_v2, %v109_v1  ;;  %v34_v9 = vmul.f32 %v114_v3, %v109_v1  ;;  %s84_s23 = sshll.u32 %s172_s1, 4  ;;  %s85_s23 = int_to_ptr.vmem [resolvable:$true] %s84_s23 }
   0x5   :  { %v35_v10 = vmul.f32 %v117_v6, %v109_v1  ;;  %v36_v11 = vmul.f32 %v118_v7, %v109_v1  ;;  %s124_s0 = scalar_lea.vmem %s85_s23, 512  ;;  %p129_p1 = scmp.lt.s32.totalorder %s85_s23, %s85_s23 }
   0x6   :  { %v44_v12 = vadd.f32 %v110_v5, %v33_v8  ;;  %v45_v13 = vadd.f32 %v110_v5, %v34_v9  ;;  %p125_p0 = scmp.ne.s32.totalorder %s85_s23, %s124_s0  ;;  %p130_p2 = scmp.lt.s32.totalorder %s124_s0, %s124_s0 }
   0x7   :  { %v46_v14 = vadd.f32 %v110_v5, %v35_v10  ;;  %v47_v15 = vadd.f32 %v110_v5, %v36_v11 }
   0x8   :  { %v48_v16 = vmax.f32 %v44_v12, 0.0  ;;  %v49_v17 = vmax.f32 %v45_v13, 0.0  ;;  %p131_p3 = por %p130_p2, %p129_p1 }
   0x9   :  { %v50_v18 = vmax.f32 %v46_v14, 0.0  ;;  %v51_v19 = vmax.f32 %v47_v15, 0.0 }
   0xa   :  { %52 = vst [vmem:[#allocation2] sm:$0xff] %v48_v16  ;;  %53 = vst [vmem:[#allocation2 + $0x8] sm:$0xff] %v49_v17  ;;  %v56_v20 = vadd.f32 %v49_v17, %v48_v16  ;;  %p132_p4 = pnand %p131_p3, %p125_p0 }
   0xb   :  { %54 = vst [vmem:[#allocation2 + $0x10] sm:$0xff] %v50_v18  ;;  %55 = vst [vmem:[#allocation2 + $0x18] sm:$0xff] %v51_v19  ;;  %v63_v21 = vadd.f32 %v51_v19, %v50_v18 }
   0xc   :  { %v57_v22 = vrot.slane %v56_v20, 4 }
   0xd   :  { %135 = shalt.err (!%p132_p4)
}
   0xe   :  { %s136_s25 = scalar_lea.hbm %s240_s3, 512 }
   0xf   :  { %p137_p5 = scmp.ne.s32.totalorder %s240_s3, %s136_s25  ;;  %p140_p6 = scmp.lt.u32.totalorder %s136_s25, %s240_s3 }
  0x11   :  { %p142_p7 = pnand %p140_p6, %p137_p5 }
  0x13   :  { %145 = shalt.err (!%p142_p7)
}
  0x14   :  { %s173_s30 = smov 128   ;;  %s174_s5 = smov 8   ;;  %v64_v23 = vrot.slane %v63_v21, 4  ;;  %v58_v24 = vadd.f32 %v57_v22, %v56_v20  ;;  %vm75_vm0 = vcmask 1041409  }
  0x15   :  { %90 = dma.vmem_to_hbm [thread:$0]  %s85_s23, 512, %s240_s3, [#allocation3], %s173_s30, %s173_s30, %s174_s5  }
  0x16   :  { %v65_v25 = vadd.f32 %v64_v23, %v63_v21  ;;  %v59_v26 = vrot.slane %v58_v24, 2  ;;  %s175_s8 = smov [#allocation4]  }
  0x17   :  { %s97_s9 = sshll.u32 %s175_s8, 4  ;;  %s98_s9 = int_to_ptr.vmem [resolvable:$true] %s97_s9 }
  0x18   :  { %v66_v27 = vrot.slane %v65_v25, 2  ;;  %v60_v28 = vadd.f32 %v59_v26, %v58_v24  ;;  %s146_s3 = scalar_lea.vmem %s98_s9, 32  ;;  %p151_p9 = scmp.lt.s32.totalorder %s98_s9, %s98_s9 }
  0x19   :  { %p147_p8 = scmp.ne.s32.totalorder %s98_s9, %s146_s3  ;;  %p152_p10 = scmp.lt.s32.totalorder %s146_s3, %s146_s3 }
  0x1a   :  { %v67_v29 = vadd.f32 %v66_v27, %v65_v25  ;;  %v61_v30 = vrot.slane %v60_v28, 1 }
  0x1b   :  { %p153_p11 = por %p152_p10, %p151_p9 }
  0x1c   :  { %v68_v31 = vrot.slane %v67_v29, 1  ;;  %v62_v32 = vadd.f32 %v61_v30, %v60_v28 }
  0x1d   :  { %p154_p12 = pnand %p153_p11, %p147_p8 }
  0x1e   :  { %v69_v33 = vadd.f32 %v68_v31, %v67_v29  ;;  %v71_v34 = vmul.f32 0.0625, %v62_v32 }
  0x20   :  { %v72_v35 = vmul.f32 0.0625, %v69_v33 }
  0x22   :  { %v76_v36 = vsel %vm75_vm0, %v72_v35, %v71_v34 }
  0x23   :  { %78 = vst [vmem:[#allocation4] sm:$0x3] %v76_v36 }
  0x24   :  { %157 = shalt.err (!%p154_p12)
}
  0x25   :  { %s158_s12 = scalar_lea.hbm %s241_s4, 32 }
  0x26   :  { %p159_p13 = scmp.ne.s32.totalorder %s241_s4, %s158_s12  ;;  %p162_p0 = scmp.lt.u32.totalorder %s158_s12, %s241_s4 }
  0x28   :  { %p164_p1 = pnand %p162_p0, %p159_p13 }
  0x2a   :  { %167 = shalt.err (!%p164_p1)
}
  0x2b   :  { %100 = dma.vmem_to_hbm [thread:$0]  %s98_s9, 32, %s241_s4, [#allocation5]  }
  0x2c   :  { %168 = dma.done.wait [#allocation3], 512  }
  0x2d   :  { %169 = vsyncadd [#allocation3], 4294966784 }
  0x2e   :  { %170 = dma.done.wait [#allocation5], 32  }
  0x2f   :  { %171 = vsyncadd [#allocation5], 4294967264 }
  0x30   :  { %107 = vsyncpa [#allocation3], 1 }
  0x31   :  { %108 = vsyncpa [#allocation5], 1 }

// kernel: residual_encoder.6
= control target key start
LH: loop header
LB: loop body
LE: loop exit
PB: predicated region body
PF: predicated region fallthrough
CT: control target
= control target key end

     0   :  { %s2315_s15 = smov 0   ;;  %s2749_s0 = inlined_call_operand.vmem [shape: bf16[32,2048], index: 0, kind: input, shape index: {}]   ;;  %s2750_s1 = inlined_call_operand.vmem [shape: bf16[2048,128], index: 1, kind: input, shape index: {}]   ;;  %s2751_s2 = inlined_call_operand.vmem [shape: bf16[32,128], index: 2, kind: output, shape index: {0}]   ;;  %s2752_s3 = inlined_call_operand.vmem [shape: f32[2,1,128], index: 3, kind: output, shape index: {1}]   ;;  %s2753_s4 = inlined_call_operand.vmem [shape: f32[2,1,128], index: 4, kind: output, shape index: {2}]  }
   0x1 LB: > { %s2321_s16 = sadd.s32 4294967295, %s2288_s15   ;;  %p1808_p0 = scmp.ge.s32.totalorder %s2288_s15, 1  ;;  %s2288_s15 = sphi %s2315_s15, %s15_s15  }
   0x2   : > { %p169_p1 = scmp.lt.s32.totalorder %s2288_s15, 3 }
   0x4   : > { %p170_p2 = pnand %p1808_p0, %p169_p1 }
   0x5   : > { %v2154_v0 = vld [vmem:[%s2750_s1 + $0x40] sm:$0xff] (!%p170_p2)   ;;  %v2158_v4 = vld [vmem:[%s2750_s1 + $0x48] sm:$0xff] (!%p170_p2)   ;;  %v2162_v8 = vld [vmem:[%s2750_s1 + $0x50] sm:$0xff] (!%p170_p2)   ;;  %s1809_s25 = sshll.u32 (!%p170_p2), %s2321_s16, 1  ;;  %p215_p4 = scmp.lt.s32.totalorder (!%p170_p2), %s2321_s16, 1 }
   0x6   : > { %173 = sbr.rel (%p170_p2) target bundleno = 373 (0x175), region = 28  ;;  %v2155_v1 = vld [vmem:[%s2750_s1 + $0xc0] sm:$0xff] (!%p170_p2)   ;;  %1970 = vmatprep.subr.bf16.mxu0 (!%p170_p2), %v2154_v0  ;;  %v2159_v5 = vld [vmem:[%s2750_s1 + $0xc8] sm:$0xff] (!%p170_p2)   ;;  %v2163_v9 = vld [vmem:[%s2750_s1 + $0xd0] sm:$0xff] (!%p170_p2)   ;;  %p203_p3 = scmp.lt.s32.totalorder (!%p170_p2), %s1809_s25, 3 }
   0x7   : > { %v2156_v2 = vld [vmem:[%s2750_s1] sm:$0xff] (!%p170_p2)   ;;  %1992 = vmatprep.subr.bf16.mxu1 (!%p170_p2), %v2155_v1  ;;  %v2160_v6 = vld [vmem:[%s2750_s1 + $0x8] sm:$0xff] (!%p170_p2)   ;;  %v2164_v10 = vld [vmem:[%s2750_s1 + $0x10] sm:$0xff] (!%p170_p2)  }
   0x8   : > { %v2157_v3 = vld [vmem:[%s2750_s1 + $0x80] sm:$0xff] (!%p170_p2)   ;;  %1971 = vmatpush3.bf16.msra.mxu0 (!%p170_p2), %v2156_v2  ;;  %v2161_v7 = vld [vmem:[%s2750_s1 + $0x88] sm:$0xff] (!%p170_p2)   ;;  %v2165_v11 = vld [vmem:[%s2750_s1 + $0x90] sm:$0xff] (!%p170_p2)  }
   0x9   : > { %1993 = vmatpush3.bf16.msra.mxu1 (!%p170_p2), %v2157_v3  ;;  %1972 = vmatprep.subr.bf16.mxu0 (!%p170_p2), %v2158_v4  ;;  %v2166_v12 = vld [vmem:[%s2750_s1 + $0x58] sm:$0xff] (!%p170_p2)   ;;  %v2170_v16 = vld [vmem:[%s2750_s1 + $0x60] sm:$0xff] (!%p170_p2)   ;;  %v2174_v20 = vld [vmem:[%s2750_s1 + $0x68] sm:$0xff] (!%p170_p2)  }
   0xa   : > { %1994 = vmatprep.subr.bf16.mxu1 (!%p170_p2), %v2159_v5  ;;  %v2167_v13 = vld [vmem:[%s2750_s1 + $0xd8] sm:$0xff] (!%p170_p2)   ;;  %v2171_v17 = vld [vmem:[%s2750_s1 + $0xe0] sm:$0xff] (!%p170_p2)   ;;  %v2175_v21 = vld [vmem:[%s2750_s1 + $0xe8] sm:$0xff] (!%p170_p2)  }
   0xb   : > { %v2168_v14 = vld [vmem:[%s2750_s1 + $0x18] sm:$0xff] (!%p170_p2)   ;;  %v2172_v18 = vld [vmem:[%s2750_s1 + $0x20] sm:$0xff] (!%p170_p2)   ;;  %v2176_v22 = vld [vmem:[%s2750_s1 + $0x28] sm:$0xff] (!%p170_p2)  }
   0xc   : > { %1973 = vmatpush3.bf16.msra.mxu0 (!%p170_p2), %v2160_v6  ;;  %v2169_v15 = vld [vmem:[%s2750_s1 + $0x98] sm:$0xff] (!%p170_p2)   ;;  %v2173_v19 = vld [vmem:[%s2750_s1 + $0xa0] sm:$0xff] (!%p170_p2)   ;;  %v2177_v23 = vld [vmem:[%s2750_s1 + $0xa8] sm:$0xff] (!%p170_p2)  }
   0xd   : > { %1995 = vmatpush3.bf16.msra.mxu1 %v2161_v7  ;;  %1974 = vmatprep.subr.bf16.mxu0 %v2162_v8  ;;  %s2755_s25 = smov (!%p203_p3, %s1809_s25), 3  ;;  %v2178_v24 = vld [vmem:[%s2750_s1 + $0x70] sm:$0xff]   ;;  %v2182_v28 = vld [vmem:[%s2750_s1 + $0x78] sm:$0xff]   ;;  %v2186_v40 = vld [vmem:[%s2750_s1 + $0x140] sm:$0xff]   ;;  %s2757_s16 = smov (!%p215_p4, %s2321_s16), 1 }
   0xe   : > { %1996 = vmatprep.subr.bf16.mxu1 %v2163_v9  ;;  %v2179_v25 = vld [vmem:[%s2750_s1 + $0xf0] sm:$0xff]   ;;  %s1962_s24 = sshll.u32 %s2755_s25, 6  ;;  %v2183_v29 = vld [vmem:[%s2750_s1 + $0xf8] sm:$0xff]   ;;  %v2187_v41 = vld [vmem:[%s2750_s1 + $0x1c0] sm:$0xff]   ;;  %s217_s11 = scalar_lea.vmem %s2752_s3, %s2757_s16 }
   0xf   : > { %v2180_v26 = vld [vmem:[%s2750_s1 + $0x30] sm:$0xff]   ;;  %s2422_s8 = scalar_lea.vmem %s2749_s0, %s1962_s24  ;;  %v2184_v30 = vld [vmem:[%s2750_s1 + $0x38] sm:$0xff]   ;;  %v2188_v42 = vld [vmem:[%s2750_s1 + $0x100] sm:$0xff]   ;;  %s220_s14 = scalar_lea.vmem %s2753_s4, %s2757_s16 }
  0x10   : > { %1975 = vmatpush3.bf16.msra.mxu0 %v2164_v10  ;;  %v2181_v27 = vld [vmem:[%s2750_s1 + $0xb0] sm:$0xff]   ;;  %v2185_v31 = vld [vmem:[%s2750_s1 + $0xb8] sm:$0xff]   ;;  %v222_v32 = vld [vmem:[%s2422_s8] sm:$0xff] }
  0x11   : > { %1997 = vmatpush3.bf16.msra.mxu1 %v2165_v11  ;;  %1976 = vmatprep.subr.bf16.mxu0 %v2166_v12  ;;  %v230_v33 = vld [vmem:[%s2422_s8 + $0x40] sm:$0xff]  ;;  %v223_v34 = vld [vmem:[%s2422_s8 + $0x8] sm:$0xff]  ;;  %v2194_v48 = vld [vmem:[%s2750_s1 + $0x150] sm:$0xff]  }
  0x12   : > { %1998 = vmatprep.subr.bf16.mxu1 %v2167_v13  ;;  %v1814_v35 = vcombine.low %v222_v32, %v230_v33  ;;  %v1815_v36 = vcombine.high %v222_v32, %v230_v33  ;;  %v231_v37 = vld [vmem:[%s2422_s8 + $0x48] sm:$0xff]  ;;  %v2189_v43 = vld [vmem:[%s2750_s1 + $0x180] sm:$0xff]   ;;  %v2195_v49 = vld [vmem:[%s2750_s1 + $0x1d0] sm:$0xff]  }
  0x13   : > { %v1816_v38 = vcombine.low %v223_v34, %v231_v37  ;;  %v1817_v39 = vcombine.high %v223_v34, %v231_v37  ;;  %v2190_v44 = vld [vmem:[%s2750_s1 + $0x148] sm:$0xff]   ;;  %v2196_v50 = vld [vmem:[%s2750_s1 + $0x110] sm:$0xff]   ;;  %v2198_v52 = vld [vmem:[%s2750_s1 + $0x158] sm:$0xff]  }
  0x14   : > { %1977 = vmatpush3.bf16.msra.mxu0 %v2168_v14  ;;  %1374 = vmatprep.mubr.bf16.mxu0 %v1815_v36  ;;  %v2191_v45 = vld [vmem:[%s2750_s1 + $0x1c8] sm:$0xff]   ;;  %v2197_v51 = vld [vmem:[%s2750_s1 + $0x190] sm:$0xff]   ;;  %v2199_v53 = vld [vmem:[%s2750_s1 + $0x1d8] sm:$0xff]  }
  0x15   : > { %1999 = vmatpush3.bf16.msra.mxu1 %v2169_v15  ;;  %1978 = vmatprep.subr.bf16.mxu0 %v2170_v16  ;;  %v2192_v46 = vld [vmem:[%s2750_s1 + $0x108] sm:$0xff]   ;;  %v2200_v54 = vld [vmem:[%s2750_s1 + $0x118] sm:$0xff]   ;;  %v2202_v56 = vld [vmem:[%s2750_s1 + $0x160] sm:$0xff]  }
  0x16   : > { %2000 = vmatprep.subr.bf16.mxu1 %v2171_v17  ;;  %1415 = vmatprep.mubr.bf16.mxu1 %v1817_v39  ;;  %v2193_v47 = vld [vmem:[%s2750_s1 + $0x188] sm:$0xff]   ;;  %v2201_v55 = vld [vmem:[%s2750_s1 + $0x198] sm:$0xff]   ;;  %v2203_v57 = vld [vmem:[%s2750_s1 + $0x1e0] sm:$0xff]  }
  0x17   : > { %v2204_v58 = vld [vmem:[%s2750_s1 + $0x120] sm:$0xff]   ;;  %v2206_v60 = vld [vmem:[%s2750_s1 + $0x168] sm:$0xff]   ;;  %v2210_v0 = vld [vmem:[%s2750_s1 + $0x170] sm:$0xff]  }
  0x18   : > { %1979 = vmatpush3.bf16.msra.mxu0 %v2172_v18  ;;  %v2205_v59 = vld [vmem:[%s2750_s1 + $0x1a0] sm:$0xff]   ;;  %v2207_v61 = vld [vmem:[%s2750_s1 + $0x1e8] sm:$0xff]   ;;  %v2211_v1 = vld [vmem:[%s2750_s1 + $0x1f0] sm:$0xff]  }
  0x19   : > { %2001 = vmatpush3.bf16.msra.mxu1 %v2173_v19  ;;  %1980 = vmatprep.subr.bf16.mxu0 %v2174_v20  ;;  %v2208_v62 = vld [vmem:[%s2750_s1 + $0x128] sm:$0xff]   ;;  %v2212_v2 = vld [vmem:[%s2750_s1 + $0x130] sm:$0xff]   ;;  %v2214_v4 = vld [vmem:[%s2750_s1 + $0x178] sm:$0xff]  }
  0x1a   : > { %2002 = vmatprep.subr.bf16.mxu1 %v2175_v21  ;;  %v2209_v63 = vld [vmem:[%s2750_s1 + $0x1a8] sm:$0xff]   ;;  %v2213_v3 = vld [vmem:[%s2750_s1 + $0x1b0] sm:$0xff]   ;;  %v2215_v5 = vld [vmem:[%s2750_s1 + $0x1f8] sm:$0xff]  }
  0x1b   : > { %v2216_v6 = vld [vmem:[%s2750_s1 + $0x138] sm:$0xff]   ;;  %v224_v8 = vld [vmem:[%s2422_s8 + $0x10] sm:$0xff]  ;;  %v2218_v16 = vld [vmem:[%s2750_s1 + $0x240] sm:$0xff]  }
  0x1c   : > { %1981 = vmatpush3.bf16.msra.mxu0 %v2176_v22  ;;  %v2217_v7 = vld [vmem:[%s2750_s1 + $0x1b8] sm:$0xff]   ;;  %v232_v9 = vld [vmem:[%s2422_s8 + $0x50] sm:$0xff]  ;;  %v2219_v17 = vld [vmem:[%s2750_s1 + $0x2c0] sm:$0xff]  }
  0x1d   : > { %2003 = vmatpush3.bf16.msra.mxu1 %v2177_v23  ;;  %1982 = vmatprep.subr.bf16.mxu0 %v2178_v24  ;;  %v1818_v10 = vcombine.low %v224_v8, %v232_v9  ;;  %v1819_v11 = vcombine.high %v224_v8, %v232_v9  ;;  %v225_v12 = vld [vmem:[%s2422_s8 + $0x18] sm:$0xff]  ;;  %v2220_v18 = vld [vmem:[%s2750_s1 + $0x200] sm:$0xff]   ;;  %v2222_v20 = vld [vmem:[%s2750_s1 + $0x248] sm:$0xff]  }
  0x1e   : > { %2004 = vmatprep.subr.bf16.mxu1 %v2179_v25  ;;  %v233_v13 = vld [vmem:[%s2422_s8 + $0x58] sm:$0xff]  ;;  %v2221_v19 = vld [vmem:[%s2750_s1 + $0x280] sm:$0xff]   ;;  %v2223_v21 = vld [vmem:[%s2750_s1 + $0x2c8] sm:$0xff]  }
  0x1f   : > { %v1820_v14 = vcombine.low %v225_v12, %v233_v13  ;;  %v1821_v15 = vcombine.high %v225_v12, %v233_v13  ;;  %v2224_v22 = vld [vmem:[%s2750_s1 + $0x208] sm:$0xff]   ;;  %v2226_v24 = vld [vmem:[%s2750_s1 + $0x250] sm:$0xff]   ;;  %v2234_v32 = vld [vmem:[%s2750_s1 + $0x260] sm:$0xff]  }
  0x20   : > { %1983 = vmatpush3.bf16.msra.mxu0 %v2180_v26  ;;  %v2225_v23 = vld [vmem:[%s2750_s1 + $0x288] sm:$0xff]   ;;  %v2227_v25 = vld [vmem:[%s2750_s1 + $0x2d0] sm:$0xff]   ;;  %v2235_v33 = vld [vmem:[%s2750_s1 + $0x2e0] sm:$0xff]  }
  0x21   : > { %2005 = vmatpush3.bf16.msra.mxu1 %v2181_v27  ;;  %1984 = vmatprep.subr.bf16.mxu0 %v2182_v28  ;;  %v2228_v26 = vld [vmem:[%s2750_s1 + $0x210] sm:$0xff]   ;;  %v2230_v28 = vld [vmem:[%s2750_s1 + $0x258] sm:$0xff]   ;;  %v2236_v34 = vld [vmem:[%s2750_s1 + $0x220] sm:$0xff]  }
  0x22   : > { %2006 = vmatprep.subr.bf16.mxu1 %v2183_v29  ;;  %v2229_v27 = vld [vmem:[%s2750_s1 + $0x290] sm:$0xff]   ;;  %v2231_v29 = vld [vmem:[%s2750_s1 + $0x2d8] sm:$0xff]   ;;  %v2238_v36 = vld [vmem:[%s2750_s1 + $0x268] sm:$0xff]  }
  0x23   : > { %v2239_v37 = vld [vmem:[%s2750_s1 + $0x2e8] sm:$0xff]   ;;  %v2266_v8 = vld [vmem:[%s2750_s1 + $0x360] sm:$0xff]  }
  0x24   : > { %1985 = vmatpush3.bf16.msra.mxu0 %v2184_v30  ;;  %v2232_v30 = vld [vmem:[%s2750_s1 + $0x218] sm:$0xff]   ;;  %v2241_v39 = vld [vmem:[%s2750_s1 + $0x2a8] sm:$0xff]   ;;  %v2267_v9 = vld [vmem:[%s2750_s1 + $0x3e0] sm:$0xff]  }
  0x25   : > { %2007 = vmatpush3.bf16.msra.mxu1 %v2185_v31  ;;  %2014 = vmatprep.subr.bf16.mxu0 %v2186_v40  ;;  %v2233_v31 = vld [vmem:[%s2750_s1 + $0x298] sm:$0xff]   ;;  %v2242_v40 = vld [vmem:[%s2750_s1 + $0x270] sm:$0xff]   ;;  %v2270_v12 = vld [vmem:[%s2750_s1 + $0x368] sm:$0xff]  }
  0x26   : > { %2036 = vmatprep.subr.bf16.mxu1 %v2187_v41  ;;  %v2243_v41 = vld [vmem:[%s2750_s1 + $0x2f0] sm:$0xff]   ;;  %v2271_v13 = vld [vmem:[%s2750_s1 + $0x3e8] sm:$0xff]  }
  0x27   : > { %1375 = vmatmul.mubr.bf16.vlgmr.msra.gmra.mrb[0].mxu0 %v1814_v35  ;;  %v2237_v35 = vld [vmem:[%s2750_s1 + $0x2a0] sm:$0xff]  }
  0x28   : > { %1416 = vmatmul.mubr.bf16.vlgmr.msra.gmra.mrb[0].mxu1 %v1816_v38  ;;  %2015 = vmatpush3.bf16.msra.mxu0 %v2188_v42  ;;  %v2240_v38 = vld [vmem:[%s2750_s1 + $0x228] sm:$0xff]   ;;  %v2244_v42 = vld [vmem:[%s2750_s1 + $0x230] sm:$0xff]  }
  0x29   : > { %2037 = vmatpush3.bf16.msra.mxu1 %v2189_v43  ;;  %2016 = vmatprep.subr.bf16.mxu0 %v2190_v44  ;;  %v2245_v43 = vld [vmem:[%s2750_s1 + $0x2b0] sm:$0xff]   ;;  %v2246_v44 = vld [vmem:[%s2750_s1 + $0x278] sm:$0xff]  }
  0x2a   : > { %2038 = vmatprep.subr.bf16.mxu1 %v2191_v45  ;;  %1456 = vmatprep.mubr.bf16.mxu0 %v1819_v11  ;;  %v2247_v45 = vld [vmem:[%s2750_s1 + $0x2f8] sm:$0xff]   ;;  %v2269_v11 = vld [vmem:[%s2750_s1 + $0x3a0] sm:$0xff]  }
  0x2b   : > { %1497 = vmatprep.mubr.bf16.mxu1 %v1821_v15  ;;  %v2273_v15 = vld [vmem:[%s2750_s1 + $0x3a8] sm:$0xff]  }
  0x2c   : > { %2017 = vmatpush3.bf16.msra.mxu0 %v2192_v46  ;;  %v2248_v46 = vld [vmem:[%s2750_s1 + $0x238] sm:$0xff]  }
  0x2d   : > { %2039 = vmatpush3.bf16.msra.mxu1 %v2193_v47  ;;  %2018 = vmatprep.subr.bf16.mxu0 %v2194_v48  ;;  %v2249_v47 = vld [vmem:[%s2750_s1 + $0x2b8] sm:$0xff]   ;;  %v226_v48 = vld [vmem:[%s2422_s8 + $0x20] sm:$0xff] }
  0x2e   : > { %2040 = vmatprep.subr.bf16.mxu1 %v2195_v49  ;;  %v234_v49 = vld [vmem:[%s2422_s8 + $0x60] sm:$0xff] }
  0x30   : > { %2019 = vmatpush3.bf16.msra.mxu0 %v2196_v50  ;;  %v227_v50 = vld [vmem:[%s2422_s8 + $0x28] sm:$0xff] }
  0x31   : > { %2041 = vmatpush3.bf16.msra.mxu1 %v2197_v51  ;;  %2020 = vmatprep.subr.bf16.mxu0 %v2198_v52  ;;  %v235_v51 = vld [vmem:[%s2422_s8 + $0x68] sm:$0xff]  ;;  %v1822_v52 = vcombine.low %v226_v48, %v234_v49 }
  0x32   : > { %2042 = vmatprep.subr.bf16.mxu1 %v2199_v53  ;;  %v1823_v53 = vcombine.high %v226_v48, %v234_v49 }
  0x34   : > { %2021 = vmatpush3.bf16.msra.mxu0 %v2200_v54  ;;  %v1824_v54 = vcombine.low %v227_v50, %v235_v51 }
  0x35   : > { %2043 = vmatpush3.bf16.msra.mxu1 %v2201_v55  ;;  %2022 = vmatprep.subr.bf16.mxu0 %v2202_v56  ;;  %v1825_v55 = vcombine.high %v227_v50, %v235_v51  ;;  %v2250_v56 = vld [vmem:[%s2750_s1 + $0x340] sm:$0xff]  }
  0x36   : > { %2044 = vmatprep.subr.bf16.mxu1 %v2203_v57  ;;  %v2251_v57 = vld [vmem:[%s2750_s1 + $0x3c0] sm:$0xff]  }
  0x38   : > { %2023 = vmatpush3.bf16.msra.mxu0 %v2204_v58  ;;  %v2252_v58 = vld [vmem:[%s2750_s1 + $0x300] sm:$0xff]  }
  0x39   : > { %2045 = vmatpush3.bf16.msra.mxu1 %v2205_v59  ;;  %2024 = vmatprep.subr.bf16.mxu0 %v2206_v60  ;;  %v2253_v59 = vld [vmem:[%s2750_s1 + $0x380] sm:$0xff]   ;;  %v2254_v60 = vld [vmem:[%s2750_s1 + $0x348] sm:$0xff]  }
  0x3a   : > { %2046 = vmatprep.subr.bf16.mxu1 %v2207_v61  ;;  %v2255_v61 = vld [vmem:[%s2750_s1 + $0x3c8] sm:$0xff]  }
  0x3c   : > { %2025 = vmatpush3.bf16.msra.mxu0 %v2208_v62  ;;  %v2256_v62 = vld [vmem:[%s2750_s1 + $0x308] sm:$0xff]  }
  0x3d   : > { %2047 = vmatpush3.bf16.msra.mxu1 %v2209_v63  ;;  %2026 = vmatprep.subr.bf16.mxu0 %v2210_v0  ;;  %v2257_v63 = vld [vmem:[%s2750_s1 + $0x388] sm:$0xff]   ;;  %v2258_v0 = vld [vmem:[%s2750_s1 + $0x350] sm:$0xff]  }
  0x3e   : > { %2048 = vmatprep.subr.bf16.mxu1 %v2211_v1  ;;  %v2259_v1 = vld [vmem:[%s2750_s1 + $0x3d0] sm:$0xff]  }
  0x40   : > { %2027 = vmatpush3.bf16.msra.mxu0 %v2212_v2  ;;  %v2260_v2 = vld [vmem:[%s2750_s1 + $0x310] sm:$0xff]  }
  0x41   : > { %2049 = vmatpush3.bf16.msra.mxu1 %v2213_v3  ;;  %2028 = vmatprep.subr.bf16.mxu0 %v2214_v4  ;;  %v2261_v3 = vld [vmem:[%s2750_s1 + $0x390] sm:$0xff]   ;;  %v2262_v4 = vld [vmem:[%s2750_s1 + $0x358] sm:$0xff]  }
  0x42   : > { %2050 = vmatprep.subr.bf16.mxu1 %v2215_v5  ;;  %v2263_v5 = vld [vmem:[%s2750_s1 + $0x3d8] sm:$0xff]  }
  0x44   : > { %2029 = vmatpush3.bf16.msra.mxu0 %v2216_v6  ;;  %v2264_v6 = vld [vmem:[%s2750_s1 + $0x318] sm:$0xff]  }
  0x45   : > { %2051 = vmatpush3.bf16.msra.mxu1 %v2217_v7  ;;  %2058 = vmatprep.subr.bf16.mxu0 %v2218_v16  ;;  %v2265_v7 = vld [vmem:[%s2750_s1 + $0x398] sm:$0xff]   ;;  %v2274_v16 = vld [vmem:[%s2750_s1 + $0x370] sm:$0xff]  }
  0x46   : > { %2080 = vmatprep.subr.bf16.mxu1 %v2219_v17  ;;  %v2275_v17 = vld [vmem:[%s2750_s1 + $0x3f0] sm:$0xff]  }
  0x47   : > { %1457 = vmatmul.mubr.bf16.vlgmr.msra.gmra.mrb[4].mxu0 %v1818_v10  ;;  %v2268_v10 = vld [vmem:[%s2750_s1 + $0x320] sm:$0xff]  }
  0x48   : > { %1498 = vmatmul.mubr.bf16.vlgmr.msra.gmra.mrb[4].mxu1 %v1820_v14  ;;  %2059 = vmatpush3.bf16.msra.mxu0 %v2220_v18  ;;  %v2272_v14 = vld [vmem:[%s2750_s1 + $0x328] sm:$0xff]   ;;  %v2276_v18 = vld [vmem:[%s2750_s1 + $0x330] sm:$0xff]  }
  0x49   : > { %2081 = vmatpush3.bf16.msra.mxu1 %v2221_v19  ;;  %2060 = vmatprep.subr.bf16.mxu0 %v2222_v20  ;;  %v2277_v19 = vld [vmem:[%s2750_s1 + $0x3b0] sm:$0xff]   ;;  %v2278_v20 = vld [vmem:[%s2750_s1 + $0x378] sm:$0xff]  }
  0x4a   : > { %2082 = vmatprep.subr.bf16.mxu1 %v2223_v21  ;;  %1538 = vmatprep.mubr.bf16.mxu0 %v1823_v53  ;;  %v2279_v21 = vld [vmem:[%s2750_s1 + $0x3f8] sm:$0xff]  }
  0x4b   : > { %1579 = vmatprep.mubr.bf16.mxu1 %v1825_v55 }
  0x4c   : > { %2061 = vmatpush3.bf16.msra.mxu0 %v2224_v22  ;;  %v2280_v22 = vld [vmem:[%s2750_s1 + $0x338] sm:$0xff]  }
  0x4d   : > { %2083 = vmatpush3.bf16.msra.mxu1 %v2225_v23  ;;  %2062 = vmatprep.subr.bf16.mxu0 %v2226_v24  ;;  %v2281_v23 = vld [vmem:[%s2750_s1 + $0x3b8] sm:$0xff]   ;;  %v228_v24 = vld [vmem:[%s2422_s8 + $0x30] sm:$0xff] }
  0x4e   : > { %2084 = vmatprep.subr.bf16.mxu1 %v2227_v25  ;;  %v236_v25 = vld [vmem:[%s2422_s8 + $0x70] sm:$0xff] }
  0x50   : > { %2063 = vmatpush3.bf16.msra.mxu0 %v2228_v26  ;;  %v229_v26 = vld [vmem:[%s2422_s8 + $0x38] sm:$0xff] }
  0x51   : > { %2085 = vmatpush3.bf16.msra.mxu1 %v2229_v27  ;;  %2064 = vmatprep.subr.bf16.mxu0 %v2230_v28  ;;  %v1826_v27 = vcombine.low %v228_v24, %v236_v25  ;;  %v1827_v28 = vcombine.high %v228_v24, %v236_v25 }
  0x52   : > { %2086 = vmatprep.subr.bf16.mxu1 %v2231_v29  ;;  %v237_v29 = vld [vmem:[%s2422_s8 + $0x78] sm:$0xff]  ;;  %s1813_s8 = sshll.u32 %s2755_s25, 2 }
  0x53   : > { %s213_s9 = scalar_lea.vmem %s2751_s2, %s1813_s8 }
  0x54   : > { %2065 = vmatpush3.bf16.msra.mxu0 %v2232_v30  ;;  %v1828_v30 = vcombine.low %v229_v26, %v237_v29 }
  0x55   : > { %2087 = vmatpush3.bf16.msra.mxu1 %v2233_v31  ;;  %2066 = vmatprep.subr.bf16.mxu0 %v2234_v32  ;;  %v1829_v31 = vcombine.high %v229_v26, %v237_v29 }
  0x56   : > { %2088 = vmatprep.subr.bf16.mxu1 %v2235_v33 }
  0x58   : > { %2067 = vmatpush3.bf16.msra.mxu0 %v2236_v34 }
  0x59   : > { %2089 = vmatpush3.bf16.msra.mxu1 %v2237_v35  ;;  %2068 = vmatprep.subr.bf16.mxu0 %v2238_v36 }
  0x5a   : > { %2090 = vmatprep.subr.bf16.mxu1 %v2239_v37 }
  0x5c   : > { %2069 = vmatpush3.bf16.msra.mxu0 %v2240_v38 }
  0x5d   : > { %2091 = vmatpush3.bf16.msra.mxu1 %v2241_v39  ;;  %2070 = vmatprep.subr.bf16.mxu0 %v2242_v40 }
  0x5e   : > { %2092 = vmatprep.subr.bf16.mxu1 %v2243_v41 }
  0x60   : > { %2071 = vmatpush3.bf16.msra.mxu0 %v2244_v42 }
  0x61   : > { %2093 = vmatpush3.bf16.msra.mxu1 %v2245_v43  ;;  %2072 = vmatprep.subr.bf16.mxu0 %v2246_v44 }
  0x62   : > { %2094 = vmatprep.subr.bf16.mxu1 %v2247_v45 }
  0x64   : > { %2073 = vmatpush3.bf16.msra.mxu0 %v2248_v46 }
  0x65   : > { %2095 = vmatpush3.bf16.msra.mxu1 %v2249_v47  ;;  %2102 = vmatprep.subr.bf16.mxu0 %v2250_v56 }
  0x66   : > { %2124 = vmatprep.subr.bf16.mxu1 %v2251_v57 }
  0x67   : > { %1539 = vmatmul.mubr.bf16.vlgmr.msra.gmra.mrb[8].mxu0 %v1822_v52 }
  0x68   : > { %1580 = vmatmul.mubr.bf16.vlgmr.msra.gmra.mrb[8].mxu1 %v1824_v54  ;;  %2103 = vmatpush3.bf16.msra.mxu0 %v2252_v58 }
  0x69   : > { %2125 = vmatpush3.bf16.msra.mxu1 %v2253_v59  ;;  %2104 = vmatprep.subr.bf16.mxu0 %v2254_v60 }
  0x6a   : > { %2126 = vmatprep.subr.bf16.mxu1 %v2255_v61  ;;  %1620 = vmatprep.mubr.bf16.mxu0 %v1827_v28 }
  0x6b   : > { %1661 = vmatprep.mubr.bf16.mxu1 %v1829_v31 }
  0x6c   : > { %2105 = vmatpush3.bf16.msra.mxu0 %v2256_v62 }
  0x6d   : > { %2127 = vmatpush3.bf16.msra.mxu1 %v2257_v63  ;;  %2106 = vmatprep.subr.bf16.mxu0 %v2258_v0 }
  0x6e   : > { %2128 = vmatprep.subr.bf16.mxu1 %v2259_v1 }
  0x70   : > { %2107 = vmatpush3.bf16.msra.mxu0 %v2260_v2 }
  0x71   : > { %2129 = vmatpush3.bf16.msra.mxu1 %v2261_v3  ;;  %2108 = vmatprep.subr.bf16.mxu0 %v2262_v4 }
  0x72   : > { %2130 = vmatprep.subr.bf16.mxu1 %v2263_v5 }
  0x74   : > { %2109 = vmatpush3.bf16.msra.mxu0 %v2264_v6 }
  0x75   : > { %2131 = vmatpush3.bf16.msra.mxu1 %v2265_v7  ;;  %2110 = vmatprep.subr.bf16.mxu0 %v2266_v8 }
  0x76   : > { %2132 = vmatprep.subr.bf16.mxu1 %v2267_v9 }
  0x78   : > { %2111 = vmatpush3.bf16.msra.mxu0 %v2268_v10 }
  0x79   : > { %2133 = vmatpush3.bf16.msra.mxu1 %v2269_v11  ;;  %2112 = vmatprep.subr.bf16.mxu0 %v2270_v12 }
  0x7a   : > { %2134 = vmatprep.subr.bf16.mxu1 %v2271_v13 }
  0x7c   : > { %2113 = vmatpush3.bf16.msra.mxu0 %v2272_v14 }
  0x7d   : > { %2135 = vmatpush3.bf16.msra.mxu1 %v2273_v15  ;;  %2114 = vmatprep.subr.bf16.mxu0 %v2274_v16 }
  0x7e   : > { %2136 = vmatprep.subr.bf16.mxu1 %v2275_v17 }
  0x80   : > { %2115 = vmatpush3.bf16.msra.mxu0 %v2276_v18 }
  0x81   : > { %2137 = vmatpush3.bf16.msra.mxu1 %v2277_v19  ;;  %2116 = vmatprep.subr.bf16.mxu0 %v2278_v20 }
  0x82   : > { %2138 = vmatprep.subr.bf16.mxu1 %v2279_v21 }
  0x84   : > { %2117 = vmatpush3.bf16.msra.mxu0 %v2280_v22 }
  0x85   : > { %2139 = vmatpush3.bf16.msra.mxu1 %v2281_v23 }
  0x87   : > { %1621 = vmatmul.mubr.bf16.vlgmr.msra.gmra.mrb[12].mxu0 %v1826_v27 }
  0x88   : > { %1662 = vmatmul.mubr.bf16.vlgmr.msra.gmra.mrb[12].mxu1 %v1828_v30 }
  0xfa   : > { %v1986_v32 = vpop.f32.mrb[0].mxu0 }
  0xfb   : > { %v2008_v33 = vpop.f32.mrb[0].mxu1  ;;  %v1987_v34 = vpop.f32.mrb[1].mxu0 }
  0xfc   : > { %v1988_v35 = vadd.f32 %v1987_v34, %v1986_v32  ;;  %v2009_v36 = vpop.f32.mrb[1].mxu1  ;;  %v1989_v37 = vpop.f32.mrb[2].mxu0 }
  0xfd   : > { %v2010_v38 = vadd.f32 %v2009_v36, %v2008_v33  ;;  %v2011_v39 = vpop.f32.mrb[2].mxu1  ;;  %v1990_v40 = vpop.f32.mrb[3].mxu0 }
  0xfe   : > { %v1991_v41 = vadd.f32 %v1990_v40, %v1989_v37  ;;  %v2012_v42 = vpop.f32.mrb[3].mxu1 }
  0xff   : > { %v1418_v43 = vadd.f32 %v2010_v38, %v1988_v35  ;;  %v2013_v44 = vadd.f32 %v2012_v42, %v2011_v39 }
 0x101   : > { %v1421_v45 = vadd.f32 %v2013_v44, %v1991_v41 }
 0x11a   : > { %v2030_v46 = vpop.f32.mrb[4].mxu0 }
 0x11b   : > { %v2052_v47 = vpop.f32.mrb[4].mxu1  ;;  %v2031_v48 = vpop.f32.mrb[5].mxu0 }
 0x11c   : > { %v2032_v49 = vadd.f32 %v2031_v48, %v2030_v46  ;;  %v2053_v50 = vpop.f32.mrb[5].mxu1  ;;  %v2033_v51 = vpop.f32.mrb[6].mxu0 }
 0x11d   : > { %v2054_v52 = vadd.f32 %v2053_v50, %v2052_v47  ;;  %v2055_v53 = vpop.f32.mrb[6].mxu1  ;;  %v2034_v54 = vpop.f32.mrb[7].mxu0 }
 0x11e   : > { %v1459_v55 = vadd.f32 %v2032_v49, %v1418_v43  ;;  %v2035_v56 = vadd.f32 %v2034_v54, %v2033_v51  ;;  %v2056_v57 = vpop.f32.mrb[7].mxu1 }
 0x11f   : > { %v2057_v58 = vadd.f32 %v2056_v57, %v2055_v53 }
 0x120   : > { %v1500_v59 = vadd.f32 %v2054_v52, %v1459_v55  ;;  %v1462_v60 = vadd.f32 %v2035_v56, %v1421_v45 }
 0x122   : > { %v1503_v61 = vadd.f32 %v2057_v58, %v1462_v60 }
 0x13a   : > { %v2074_v62 = vpop.f32.mrb[8].mxu0 }
 0x13b   : > { %v2096_v63 = vpop.f32.mrb[8].mxu1  ;;  %v2075_v0 = vpop.f32.mrb[9].mxu0 }
 0x13c   : > { %v2097_v1 = vpop.f32.mrb[9].mxu1  ;;  %v2076_v2 = vadd.f32 %v2075_v0, %v2074_v62  ;;  %v2077_v4 = vpop.f32.mrb[10].mxu0 }
 0x13d   : > { %v2098_v3 = vadd.f32 %v2097_v1, %v2096_v63  ;;  %v2099_v5 = vpop.f32.mrb[10].mxu1  ;;  %v2078_v6 = vpop.f32.mrb[11].mxu0 }
 0x13e   : > { %v2100_v7 = vpop.f32.mrb[11].mxu1  ;;  %v1541_v8 = vadd.f32 %v2076_v2, %v1500_v59  ;;  %v2079_v9 = vadd.f32 %v2078_v6, %v2077_v4 }
 0x13f   : > { %v2101_v10 = vadd.f32 %v2100_v7, %v2099_v5 }
 0x140   : > { %v1582_v11 = vadd.f32 %v2098_v3, %v1541_v8  ;;  %v1544_v12 = vadd.f32 %v2079_v9, %v1503_v61 }
 0x142   : > { %v1585_v13 = vadd.f32 %v2101_v10, %v1544_v12 }
 0x15a   : > { %v2118_v14 = vpop.f32.mrb[12].mxu0 }
 0x15b   : > { %v2140_v15 = vpop.f32.mrb[12].mxu1  ;;  %v2119_v16 = vpop.f32.mrb[13].mxu0 }
 0x15c   : > { %v2120_v17 = vadd.f32 %v2119_v16, %v2118_v14  ;;  %v2141_v18 = vpop.f32.mrb[13].mxu1  ;;  %v2121_v19 = vpop.f32.mrb[14].mxu0 }
 0x15d   : > { %v2142_v20 = vadd.f32 %v2141_v18, %v2140_v15  ;;  %v2143_v21 = vpop.f32.mrb[14].mxu1  ;;  %v2122_v22 = vpop.f32.mrb[15].mxu0 }
 0x15e   : > { %v1623_v23 = vadd.f32 %v2120_v17, %v1582_v11  ;;  %v2123_v24 = vadd.f32 %v2122_v22, %v2121_v19  ;;  %v2144_v25 = vpop.f32.mrb[15].mxu1 }
 0x15f   : > { %v2145_v26 = vadd.f32 %v2144_v25, %v2143_v21 }
 0x160   : > { %v1664_v27 = vadd.f32 %v2142_v20, %v1623_v23  ;;  %v1626_v28 = vadd.f32 %v2123_v24, %v1585_v13 }
 0x162   : > { %v1667_v29 = vadd.f32 %v2145_v26, %v1626_v28  ;;  %v1688_v30 = vmul.f32 %v1664_v27, %v1664_v27 }
 0x164   : > { %v1968_v31 = vpack.c.bf16 %v1667_v29, %v1664_v27  ;;  %v1680_v32 = vadd.f32 %v1667_v29, %v1664_v27  ;;  %v1689_v33 = vmul.f32 %v1667_v29, %v1667_v29 }
 0x166   : > { %1969 = vst [vmem:[%s213_s9] sm:$0xff] %v1968_v31   ;;  %v1681_v34 = vrot.slane %v1680_v32, 4  ;;  %v1690_v35 = vadd.f32 %v1689_v33, %v1688_v30 }
 0x168   : > { %v1682_v36 = vadd.f32 %v1681_v34, %v1680_v32  ;;  %v1691_v37 = vrot.slane %v1690_v35, 4 }
 0x16a   : > { %v1683_v38 = vrot.slane %v1682_v36, 2  ;;  %v1692_v39 = vadd.f32 %v1691_v37, %v1690_v35 }
 0x16c   : > { %v1684_v40 = vadd.f32 %v1683_v38, %v1682_v36  ;;  %v1693_v41 = vrot.slane %v1692_v39, 2 }
 0x16e   : > { %v1685_v42 = vrot.slane %v1684_v40, 1  ;;  %v1694_v43 = vadd.f32 %v1693_v41, %v1692_v39 }
 0x170   : > { %v1686_v44 = vadd.f32 %v1685_v42, %v1684_v40  ;;  %v1695_v45 = vrot.slane %v1694_v43, 1 }
 0x172   : > { %1687 = vst [vmem:[%s217_s11] sm:$0x1] %v1686_v44  ;;  %v1696_v46 = vadd.f32 %v1695_v45, %v1694_v43 }
 0x174   : > { %1697 = vst [vmem:[%s220_s14] sm:$0x1] %v1696_v46 }
 0x175 PF: > { %s15_s15 = sadd.s32 1, %s2288_s15  }
 0x176   : > { %p12_p5 = scmp.ge.s32.totalorder %s15_s15, 4  }
 0x178   :  { %14 = sbr.rel (!%p12_p5) target bundleno = 1 (0x1), region = 82 }

</bundles_post_ra>
